<compile_context>
chip_gen: v7x
topology: tpu7x:2x2x1
jax: 0.10.0
libtpu: 0.0.40
codegen_flags: <defaults>
</compile_context>

<pallas_src>
import functools

import jax
import jax.numpy as jnp
from jax.experimental import pallas as pl
from jax.experimental.pallas import tpu as pltpu


# --------------------------------------------------------------------------- #
# Helpers
# --------------------------------------------------------------------------- #
def _round_up(x, m):
    return ((x + m - 1) // m) * m


def _device_kind():
    return jax.devices()[0].device_kind.lower()


def bf16_transcendentals_supported():
    """v6e / v7x have a bf16 EUP+VPU (fast bf16 tanh); v5e and older do not."""
    kind = _device_kind()
    return any(tag in kind for tag in ("v6", "v7", "7x"))


def _vmem_capacity_bytes():
    """Per-TensorCore VMEM capacity, generation aware (v7x: 64 MiB, v5e/v6e: 128 MiB)."""
    get_info = getattr(pltpu, "get_tpu_info", None)
    if get_info is not None:
        try:
            cap = getattr(get_info(), "vmem_capacity_bytes", None)
            if cap:
                return int(cap)
        except Exception:
            # Hardware-info query only; fall through to the device-kind table.
            pass
    kind = _device_kind()
    if any(tag in kind for tag in ("v7", "7x")):
        return 64 << 20
    if any(tag in kind for tag in ("v4", "v5", "v6")):
        return 128 << 20
    return 64 << 20  # unknown chip: assume the smallest (v7x-sized) VMEM


_SINGLE_BUFFER_WEIGHTS = None


def _weights_single_buffer_supported():
    """Detect once (with a tiny probe kernel) whether this JAX/Mosaic accepts
    pipeline_mode=pl.Buffered(1) on constant-index in_specs, which reclaims the
    second VMEM buffer of resident weights.  A probe failure only disables the
    optimization; the real MLP kernel is compiled exactly once, un-wrapped."""
    global _SINGLE_BUFFER_WEIGHTS
    if _SINGLE_BUFFER_WEIGHTS is None:
        def probe_kernel(a_ref, b_ref, o_ref):
            o_ref[...] = a_ref[...] + b_ref[...]

        try:
            out = pl.pallas_call(
                probe_kernel,
                out_shape=jax.ShapeDtypeStruct((16, 128), jnp.float32),
                grid=(2,),
                in_specs=[
                    pl.BlockSpec((8, 128), lambda i: (0, 0)),
                    pl.BlockSpec((8, 128), lambda i: (0, 0),
                                 pipeline_mode=pl.Buffered(1)),
                ],
                out_specs=pl.BlockSpec((8, 128), lambda i: (i, 0)),
            )(jnp.zeros((8, 128), jnp.float32), jnp.ones((8, 128), jnp.float32))
            jax.block_until_ready(out)
            _SINGLE_BUFFER_WEIGHTS = True
        except Exception:
            # Capability probe only (older JAX without pipeline_mode / Buffered).
            _SINGLE_BUFFER_WEIGHTS = False
    return _SINGLE_BUFFER_WEIGHTS


# --------------------------------------------------------------------------- #
# Kernels
# --------------------------------------------------------------------------- #
def _mlp_kernel_resident(x_ref, w1_ref, b1_ref, w2_ref, b2_ref, o_ref,
                         *, tanh_in_bf16):
    # hidden = tanh(x @ W1 + b1); bf16 MXU operands, f32 accumulation.
    h = jnp.dot(x_ref[...].astype(w1_ref.dtype), w1_ref[...],
                preferred_element_type=jnp.float32)
    h = h + b1_ref[...]
    if tanh_in_bf16:          # v6e/v7x: bf16 EUP, halves the hidden footprint
        h = jnp.tanh(h.astype(jnp.bfloat16))
    else:                     # v5e: no bf16 EUP/VPU -> stay in f32
        h = jnp.tanh(h)
    # F.dropout with training=False is the identity -> nothing to do here.
    # TODO(synk): training-mode dropout would use pltpu.prng_seed/prng_random_bits.
    o = jnp.dot(h.astype(w2_ref.dtype), w2_ref[...],
                preferred_element_type=jnp.float32)
    o_ref[...] = (o + b2_ref[...]).astype(o_ref.dtype)


def _mlp_kernel_ktiled(x_ref, w1_ref, b1_ref, w2_ref, b2_ref, o_ref, h_acc,
                       *, tanh_in_bf16):
    # D_in-reduction variant: W1 is streamed in (tile_k, H) slabs, the hidden
    # pre-activation is accumulated in an f32 VMEM scratch, and the epilogue
    # (bias + tanh + second matmul + store) runs on the last K step only.
    k = pl.program_id(1)

    @pl.when(k == 0)
    def _():
        h_acc[...] = jnp.zeros_like(h_acc)

    h_acc[...] += jnp.dot(x_ref[...].astype(w1_ref.dtype), w1_ref[...],
                          preferred_element_type=jnp.float32)

    @pl.when(k == pl.num_programs(1) - 1)
    def _():
        h = h_acc[...] + b1_ref[...]
        if tanh_in_bf16:
            h = jnp.tanh(h.astype(jnp.bfloat16))
        else:
            h = jnp.tanh(h)
        o = jnp.dot(h.astype(w2_ref.dtype), w2_ref[...],
                    preferred_element_type=jnp.float32)
        o_ref[...] = (o + b2_ref[...]).astype(o_ref.dtype)


# --------------------------------------------------------------------------- #
# Parameter preparation (one-time, hoisted out of the per-call path)
# --------------------------------------------------------------------------- #
def prepare_params(w1, b1, w2, b2, *, mm_dtype=jnp.bfloat16):
    """One-time preprocessing: zero-pad D_out to a multiple of 128 (lane-dense,
    unmasked output stores) and cast the matmul operands to the MXU dtype.
    Biases stay f32 (added post-accumulation).

    w1: (D_in, H) = torch linear1.weight.T, b1: (H,) or (1, H),
    w2: (H, D_out), b2: (1, D_out) or (D_out,)."""
    D_in, H = w1.shape
    H_w, D_out = w2.shape
    assert H_w == H
    b1 = jnp.asarray(b1).reshape(1, H).astype(jnp.float32)
    b2 = jnp.asarray(b2).reshape(1, D_out).astype(jnp.float32)
    D_out_p = _round_up(D_out, 128)
    if D_out_p != D_out:
        w2 = jnp.pad(w2, ((0, 0), (0, D_out_p - D_out)))
        b2 = jnp.pad(b2, ((0, 0), (0, D_out_p - D_out)))
    return {
        "w1": jnp.asarray(w1).astype(mm_dtype),
        "b1": b1,
        "w2": jnp.asarray(w2).astype(mm_dtype),
        "b2": b2,
        "d_out": int(D_out),
    }


# --------------------------------------------------------------------------- #
# Forward wrapper
# --------------------------------------------------------------------------- #
def _pick_tile_n(N):
    # Fill the 256-wide MXU on v6e/v7x, amortize the ~0.35us/step grid overhead
    # (the lever that matters on v5e), while keeping >= 2 grid steps so the
    # "parallel" batch axis can shard across v7x's two TensorCores.
    for cand in (512, 256, 128):
        if N > cand:
            return cand
    return max(8, _round_up(min(N, 128), 8))


def basic_mlp_forward(x, params, *, tile_n=None, tile_k=None,
                      use_k_tiling=None, out_dtype=None, tanh_in_bf16=None):
    """Fused BasicMLP forward: tanh(x @ w1 + b1) @ w2 + b2 (dropout = identity).

    x: (N, D_in); params from prepare_params().  Returns (N, D_out) in
    out_dtype (default x.dtype; pass jnp.bfloat16 to halve output DMA bytes)."""
    w1, b1, w2, b2 = params["w1"], params["b1"], params["w2"], params["b2"]
    d_out = params["d_out"]
    N, D_in = x.shape
    D_in_w, H = w1.shape
    H_w, D_out_p = w2.shape
    assert D_in_w == D_in and H_w == H
    out_dtype = x.dtype if out_dtype is None else out_dtype
    mm_dtype = w1.dtype
    if tanh_in_bf16 is None:
        tanh_in_bf16 = bf16_transcendentals_supported()

    single_buffer = _weights_single_buffer_supported()
    vmem_cap = int(0.85 * _vmem_capacity_bytes())      # headroom for Mosaic scratch
    mmb = jnp.dtype(mm_dtype).itemsize
    xb = jnp.dtype(x.dtype).itemsize
    outb = jnp.dtype(out_dtype).itemsize

    # --- batch tile (ragged N handled by Pallas edge masking, no pad/slice) ---
    if tile_n is None:
        tile_n = _pick_tile_n(N)
    else:
        tile_n = max(8, _round_up(min(int(tile_n), _round_up(N, 8)), 8))
    grid_n = pl.cdiv(N, tile_n)

    # --- VMEM accounting, consistent with the buffering mode actually used ----
    wbuf = 1 if single_buffer else 2
    w1_bytes = D_in * H * mmb
    w2_bytes = H * D_out_p * mmb + (H + D_out_p) * 4            # + biases (f32)
    io_bytes = 2 * (tile_n * D_in * xb + tile_n * D_out_p * outb)  # dbl-buffered
    hid_bytes = tile_n * H * (4 + mmb)       # f32 pre-act + bf16 copy for matmul2
    slack = 4 << 20
    resident_need = wbuf * (w1_bytes + w2_bytes) + io_bytes + hid_bytes + slack

    if use_k_tiling is None:
        # Route to the D_in-reduction path only when the fully-resident weights
        # no longer fit the (generation-aware) VMEM budget (mostly v7x: 64 MiB).
        use_k_tiling = (resident_need > vmem_cap) and D_in % 128 == 0 and D_in > 128

    if use_k_tiling:
        assert D_in % 128 == 0, "K-tiled path requires D_in to be a multiple of 128"

        def _k_need(tk):
            return (2 * tk * H * mmb + wbuf * w2_bytes
                    + 2 * (tile_n * tk * xb + tile_n * D_out_p * outb)
                    + hid_bytes + slack)

        if tile_k is None:
            cands = [c for c in (512, 256, 128) if D_in % c == 0]
            tile_k = next((c for c in cands if _k_need(c) <= vmem_cap), cands[-1])
        else:
            tile_k = int(tile_k)
            assert tile_k % 128 == 0 and D_in % tile_k == 0
        vmem_need = _k_need(tile_k)
    else:
        vmem_need = resident_need

    vmem_limit = int(min(max(vmem_need, 32 << 20), vmem_cap))

    cost = pl.CostEstimate(
        flops=int(2 * N * D_in * H + 2 * N * H * D_out_p),
        transcendentals=int(N * H),
        bytes_accessed=int(N * D_in * xb + w1_bytes + w2_bytes + N * D_out_p * outb),
    )

    def const_spec(shape, n_axes):
        # Constant index_map -> block stays resident; single-buffer it when the
        # installed JAX supports pipeline_mode (reclaims the second VMEM buffer).
        if n_axes == 1:
            imap = lambda i: (0,) * len(shape)
        else:
            imap = lambda i, k: (0,) * len(shape)
        if single_buffer:
            return pl.BlockSpec(shape, imap, pipeline_mode=pl.Buffered(1))
        return pl.BlockSpec(shape, imap)

    if not use_k_tiling:
        out = pl.pallas_call(
            functools.partial(_mlp_kernel_resident, tanh_in_bf16=tanh_in_bf16),
            out_shape=jax.ShapeDtypeStruct((N, D_out_p), out_dtype),
            grid=(grid_n,),
            in_specs=[
                pl.BlockSpec((tile_n, D_in), lambda i: (i, 0)),   # X tile
                const_spec((D_in, H), 1),                          # W1 resident
                const_spec((1, H), 1),                             # b1 resident
                const_spec((H, D_out_p), 1),                       # W2 resident
                const_spec((1, D_out_p), 1),                       # b2 resident
            ],
            out_specs=pl.BlockSpec((tile_n, D_out_p), lambda i: (i, 0)),
            compiler_params=pltpu.CompilerParams(
                dimension_semantics=("parallel",),
                vmem_limit_bytes=vmem_limit),
            cost_estimate=cost,
        )(x, w1, b1, w2, b2)
    else:
        grid_k = D_in // tile_k
        out = pl.pallas_call(
            functools.partial(_mlp_kernel_ktiled, tanh_in_bf16=tanh_in_bf16),
            out_shape=jax.ShapeDtypeStruct((N, D_out_p), out_dtype),
            grid=(grid_n, grid_k),                     # reduction axis last
            in_specs=[
                pl.BlockSpec((tile_n, tile_k), lambda i, k: (i, k)),  # X tile
                pl.BlockSpec((tile_k, H), lambda i, k: (k, 0)),       # W1 slab
                const_spec((1, H), 2),                                # b1 resident
                const_spec((H, D_out_p), 2),                          # W2 resident
                const_spec((1, D_out_p), 2),                          # b2 resident
            ],
            out_specs=pl.BlockSpec((tile_n, D_out_p), lambda i, k: (i, 0)),
            scratch_shapes=[pltpu.VMEM((tile_n, H), jnp.float32)],    # h accumulator
            compiler_params=pltpu.CompilerParams(
                dimension_semantics=("parallel", "arbitrary"),
                vmem_limit_bytes=vmem_limit),
            cost_estimate=cost,
        )(x, w1, b1, w2, b2)

    if d_out != D_out_p:
        out = out[:, :d_out]       # drop lane padding only (no row slice needed)
    return out


# --------------------------------------------------------------------------- #
# Reference & demo
# --------------------------------------------------------------------------- #
def mlp_reference(x, params, *, tanh_in_bf16):
    """Pure-JAX reference with the same dtype pipeline as the kernel."""
    w1, b1, w2, b2 = params["w1"], params["b1"], params["w2"], params["b2"]
    h = jnp.dot(x.astype(w1.dtype), w1, preferred_element_type=jnp.float32) + b1
    h = jnp.tanh(h.astype(jnp.bfloat16)) if tanh_in_bf16 else jnp.tanh(h)
    o = jnp.dot(h.astype(w2.dtype), w2, preferred_element_type=jnp.float32) + b2
    return o[:, :params["d_out"]].astype(x.dtype)


def init_params(key, D_in, H, D_out, dtype=jnp.float32):
    k1, k2, k3, k4 = jax.random.split(key, 4)
    # linear1 weight/bias, stored as (D_in, H) = W1.T for a plain x @ w1.
    bound1 = 1.0 / jnp.sqrt(D_in)
    w1 = jax.random.uniform(k1, (D_in, H), dtype, -bound1, bound1)
    b1 = jax.random.uniform(k2, (1, H), dtype, -bound1, bound1)
    # W2, b2: xavier_normal_ as in the module __init__.
    std_w2 = jnp.sqrt(2.0 / (H + D_out)).astype(dtype)
    std_b2 = jnp.sqrt(2.0 / (1 + D_out)).astype(dtype)
    w2 = jax.random.normal(k3, (H, D_out), dtype) * std_w2
    b2 = jax.random.normal(k4, (1, D_out), dtype) * std_b2
    return w1, b1, w2, b2


if __name__ == "__main__":
    key = jax.random.PRNGKey(0)
    tanh_bf16 = bf16_transcendentals_supported()

    # --- Test 1: resident-weights path; ragged batch (500 % 256 != 0) handled
    # by Pallas edge masking, D_out=64 exercises lane-dense output padding. ----
    N, D_in, H, D_out = 500, 128, 256, 64
    kx, kp = jax.random.split(key)
    x = jax.random.normal(kx, (N, D_in), jnp.float32)
    params = prepare_params(*init_params(kp, D_in, H, D_out))

    out = basic_mlp_forward(x, params, tanh_in_bf16=tanh_bf16)
    out = jax.block_until_ready(out)
    ref = mlp_reference(x, params, tanh_in_bf16=tanh_bf16)
    assert out.shape == (N, D_out)
    assert bool(jnp.all(jnp.isfinite(out)))
    assert jnp.allclose(out, ref, atol=3e-2, rtol=3e-2)

    # --- Test 2: D_in-reduction (K-tiled) accumulator path, forced at a small
    # shape (normally auto-selected when weights overflow v7x's 64 MiB VMEM). --
    N2, D_in2, H2, D_out2 = 96, 256, 128, 128
    kx2, kp2 = jax.random.split(kp)
    x2 = jax.random.normal(kx2, (N2, D_in2), jnp.float32)
    params2 = prepare_params(*init_params(kp2, D_in2, H2, D_out2))

    out2 = basic_mlp_forward(x2, params2, use_k_tiling=True, tile_k=128,
                             tanh_in_bf16=tanh_bf16)
    out2 = jax.block_until_ready(out2)
    ref2 = mlp_reference(x2, params2, tanh_in_bf16=tanh_bf16)
    assert out2.shape == (N2, D_out2)
    assert bool(jnp.all(jnp.isfinite(out2)))
    assert jnp.allclose(out2, ref2, atol=3e-2, rtol=3e-2)

    print("KERNEL_OK")
</pallas_src>

<mosaic_0001>
module attributes {stable_mosaic.version = 11 : i64} {
  func.func @probe_kernel(%arg0: i32, %arg1: memref<8x128xf32, #tpu.memory_space<vmem>>, %arg2: memref<8x128xf32, #tpu.memory_space<vmem>>, %arg3: memref<8x128xf32, #tpu.memory_space<vmem>>) attributes {dimension_semantics = [#tpu.dimension_semantics<arbitrary>], iteration_bounds = array<i64: 2>, scalar_prefetch = 0 : i64, scratch_operands = 0 : i64, tpu.core_type = #tpu.core_type<tc>, window_params = [{pipeline_mode = #tpu.pipeline_mode<synchronous>, transform_indices = @transform_0, window_bounds = array<i64: 8, 128>}, {pipeline_mode = #tpu.pipeline_mode<synchronous>, transform_indices = @transform_1, window_bounds = array<i64: 8, 128>}, {transform_indices = @transform_2, window_bounds = array<i64: 8, 128>}]} {
    %c0 = arith.constant 0 : index
    %c0_0 = arith.constant 0 : index
    %0 = vector.load %arg1[%c0, %c0_0] : memref<8x128xf32, #tpu.memory_space<vmem>>, vector<8x128xf32>
    %c0_1 = arith.constant 0 : index
    %c0_2 = arith.constant 0 : index
    %1 = vector.load %arg2[%c0_1, %c0_2] : memref<8x128xf32, #tpu.memory_space<vmem>>, vector<8x128xf32>
    %2 = arith.addf %0, %1 : vector<8x128xf32>
    %c0_3 = arith.constant 0 : index
    %c0_4 = arith.constant 0 : index
    %3 = vector.load %arg3[%c0_3, %c0_4] : memref<8x128xf32, #tpu.memory_space<vmem>>, vector<8x128xf32>
    tpu.vector_store %arg3[%c0_3, %c0_4], %2 {strides = array<i32>} : memref<8x128xf32, #tpu.memory_space<vmem>>, vector<8x128xf32>,
    return
  }
  func.func @transform_0(%arg0: i32) -> (i32, i32) {
    %c0_i32 = arith.constant 0 : i32
    %c0_i32_0 = arith.constant 0 : i32
    %c0_i32_1 = arith.constant 0 : i32
    return %c0_i32, %c0_i32_0 : i32, i32
  }
  func.func @transform_1(%arg0: i32) -> (i32, i32) {
    %c0_i32 = arith.constant 0 : i32
    %c0_i32_0 = arith.constant 0 : i32
    %c0_i32_1 = arith.constant 0 : i32
    return %c0_i32, %c0_i32_0 : i32, i32
  }
  func.func @transform_2(%arg0: i32) -> (i32, i32) {
    %c0_i32 = arith.constant 0 : i32
    %c0_i32_0 = arith.constant 0 : i32
    return %arg0, %c0_i32 : i32, i32
  }
}

module attributes {stable_mosaic.version = 11 : i64} {
  func.func @_mlp_kernel_resident(%arg0: i32, %arg1: memref<256x128xf32, #tpu.memory_space<vmem>>, %arg2: memref<128x256xbf16, #tpu.memory_space<vmem>>, %arg3: memref<1x256xf32, #tpu.memory_space<vmem>>, %arg4: memref<256x128xbf16, #tpu.memory_space<vmem>>, %arg5: memref<1x128xf32, #tpu.memory_space<vmem>>, %arg6: memref<256x128xf32, #tpu.memory_space<vmem>>) attributes {dimension_semantics = [#tpu.dimension_semantics<parallel>], iteration_bounds = array<i64: 2>, scalar_prefetch = 0 : i64, scratch_operands = 0 : i64, tpu.core_type = #tpu.core_type<tc>, window_params = [{transform_indices = @transform_0, window_bounds = array<i64: 256, 128>}, {pipeline_mode = #tpu.pipeline_mode<synchronous>, transform_indices = @transform_1, window_bounds = array<i64: 128, 256>}, {pipeline_mode = #tpu.pipeline_mode<synchronous>, transform_indices = @transform_2, window_bounds = array<i64: 1, 256>}, {pipeline_mode = #tpu.pipeline_mode<synchronous>, transform_indices = @transform_3, window_bounds = array<i64: 256, 128>}, {pipeline_mode = #tpu.pipeline_mode<synchronous>, transform_indices = @transform_4, window_bounds = array<i64: 1, 128>}, {transform_indices = @transform_5, window_bounds = array<i64: 256, 128>}]} {
    %c0 = arith.constant 0 : index
    %c0_0 = arith.constant 0 : index
    %0 = vector.load %arg1[%c0, %c0_0] : memref<256x128xf32, #tpu.memory_space<vmem>>, vector<256x128xf32>
    %1 = arith.truncf %0 : vector<256x128xf32> to vector<256x128xbf16>
    %c0_1 = arith.constant 0 : index
    %c0_2 = arith.constant 0 : index
    %2 = vector.load %arg2[%c0_1, %c0_2] : memref<128x256xbf16, #tpu.memory_space<vmem>>, vector<128x256xbf16>
    %cst = arith.constant dense<0.000000e+00> : vector<256x256xf32>
    %3 = tpu.matmul %1, %2, %cst {dimension_numbers = #tpu.dot_dimension_numbers<[1], [0], [0], [1], [0, 0, 1, 1], [], []>} : vector<256x128xbf16>, vector<128x256xbf16>, vector<256x256xf32> -> vector<256x256xf32>
    %c0_3 = arith.constant 0 : index
    %c0_4 = arith.constant 0 : index
    %4 = vector.load %arg3[%c0_3, %c0_4] : memref<1x256xf32, #tpu.memory_space<vmem>>, vector<1x256xf32>
    %5 = vector.broadcast %4 : vector<1x256xf32> to vector<256x256xf32>
    %6 = arith.addf %3, %5 : vector<256x256xf32>
    %7 = math.tanh %6 : vector<256x256xf32>
    %8 = arith.truncf %7 : vector<256x256xf32> to vector<256x256xbf16>
    %c0_5 = arith.constant 0 : index
    %c0_6 = arith.constant 0 : index
    %9 = vector.load %arg4[%c0_5, %c0_6] : memref<256x128xbf16, #tpu.memory_space<vmem>>, vector<256x128xbf16>
    %cst_7 = arith.constant dense<0.000000e+00> : vector<256x128xf32>
    %10 = tpu.matmul %8, %9, %cst_7 {dimension_numbers = #tpu.dot_dimension_numbers<[1], [0], [0], [1], [0, 0, 1, 1], [], []>} : vector<256x256xbf16>, vector<256x128xbf16>, vector<256x128xf32> -> vector<256x128xf32>
    %c0_8 = arith.constant 0 : index
    %c0_9 = arith.constant 0 : index
    %11 = vector.load %arg5[%c0_8, %c0_9] : memref<1x128xf32, #tpu.memory_space<vmem>>, vector<1x128xf32>
    %12 = vector.broadcast %11 : vector<1x128xf32> to vector<256x128xf32>
    %13 = arith.addf %10, %12 : vector<256x128xf32>
    %c0_10 = arith.constant 0 : index
    %c0_11 = arith.constant 0 : index
    %14 = vector.load %arg6[%c0_10, %c0_11] : memref<256x128xf32, #tpu.memory_space<vmem>>, vector<256x128xf32>
    tpu.vector_store %arg6[%c0_10, %c0_11], %13 {strides = array<i32>} : memref<256x128xf32, #tpu.memory_space<vmem>>, vector<256x128xf32>,
    return
  }
  func.func @transform_0(%arg0: i32) -> (i32, i32) {
    %c0_i32 = arith.constant 0 : i32
    %c0_i32_0 = arith.constant 0 : i32
    return %arg0, %c0_i32 : i32, i32
  }
  func.func @transform_1(%arg0: i32) -> (i32, i32) {
    %c0_i32 = arith.constant 0 : i32
    %c0_i32_0 = arith.constant 0 : i32
    %c0_i32_1 = arith.constant 0 : i32
    return %c0_i32, %c0_i32_0 : i32, i32
  }
  func.func @transform_2(%arg0: i32) -> (i32, i32) {
    %c0_i32 = arith.constant 0 : i32
    %c0_i32_0 = arith.constant 0 : i32
    %c0_i32_1 = arith.constant 0 : i32
    return %c0_i32, %c0_i32_0 : i32, i32
  }
  func.func @transform_3(%arg0: i32) -> (i32, i32) {
    %c0_i32 = arith.constant 0 : i32
    %c0_i32_0 = arith.constant 0 : i32
    %c0_i32_1 = arith.constant 0 : i32
    return %c0_i32, %c0_i32_0 : i32, i32
  }
  func.func @transform_4(%arg0: i32) -> (i32, i32) {
    %c0_i32 = arith.constant 0 : i32
    %c0_i32_0 = arith.constant 0 : i32
    %c0_i32_1 = arith.constant 0 : i32
    return %c0_i32, %c0_i32_0 : i32, i32
  }
  func.func @transform_5(%arg0: i32) -> (i32, i32) {
    %c0_i32 = arith.constant 0 : i32
    %c0_i32_0 = arith.constant 0 : i32
    return %arg0, %c0_i32 : i32, i32
  }
}

</mosaic_0001>

<bundles_post_ra>
// kernel: tpu_custom_call.1
= control target key start
LH: loop header
LB: loop body
LE: loop exit
PB: predicated region body
PF: predicated region fallthrough
CT: control target
= control target key end

     0   :  { %7 = vsyncpa [#allocation3], 0  ;;  %s620_s0 = inlined_call_operand.hbm [shape: f32[8,128], index: 0, kind: input, shape index: {}]   ;;  %s621_s1 = inlined_call_operand.hbm [shape: f32[8,128], index: 1, kind: input, shape index: {}]   ;;  %s622_s2 = inlined_call_operand.hbm [shape: f32[16,128], index: 2, kind: output, shape index: {}]  }
   0x1   :  { %8 = vsyncpa [#allocation6], 0 }
   0x2   :  { %9 = vsyncpa [#allocation4], 0 }
   0x3   :  { %11 = vsyncpa [#allocation4 + $0x1], 0  ;;  %s453_s9 = smov 0   ;;  %s455_s10 = smov 0  }
   0x4   :  { %s457_s11 = smov 0   ;;  %s459_s12 = smov 0  }
   0x5 LB: > { %s474_s13 = sadd.s32 4294967295, %s433_s12   ;;  %s235_s14 = sadd.s32 4294967294, %s433_s12   ;;  %s433_s12 = sphi %s459_s12, %s640_s12   ;;  %s429_s11 = sphi %s457_s11, %s639_s11   ;;  %s425_s10 = sphi %s455_s10, %s638_s10   ;;  %s421_s9 = sphi %s453_s9, %s637_s9  }
   0x6   : > { %s478_s15 = sadd.s32 1, %s433_s12   ;;  %s66_s16 = sadd.s32 1, %s429_s11 }
   0x7   : > { %s63_s17 = ssub.s32 %s433_s12, %s478_s15  ;;  %p76_p0 = scmp.ne.s32.totalorder %s429_s11, %s425_s10 }
   0x8   : > { %p64_p1 = scmp.eq.s32.totalorder %s63_s17, 0  ;;  %p77_p2 = scmp.eq.s32.totalorder %s474_s13, 1 }
   0x9   : > { %p82_p3 = scmp.ne.s32.totalorder %s425_s10, %s421_s9  ;;  %p83_p4 = scmp.eq.s32.totalorder %s235_s14, 1 }
   0xa   : > { %s489_s18 = scalar_select %p64_p1, %s429_s11, %s66_s16  }
   0xb   : > { %p491_p5 = por %p77_p2, %p76_p0  ;;  %p495_p6 = por %p83_p4, %p82_p3 }
   0xc   : > { %p236_p7 = scmp.ge.s32.totalorder %s433_s12, 1  ;;  %p90_p8 = scmp.lt.s32.totalorder %s433_s12, 3 }
   0xd   : > { %s626_s19 = scalar_select %p491_p5, 1, 0 }
   0xe   : > { %s627_s20 = scalar_select %p495_p6, 1, 0 }
   0xf   : > { %p623_p9 = scmp.eq.s32.totalorder %s474_s13, 0  ;;  %p502_p10 = pnand %p236_p7, %p90_p8 }
  0x10   : > { %s435_s22 = smov [#allocation2]   ;;  %s436_s24 = smov [#allocation5]  }
  0x11   : > { %s628_s21 = scalar_select %p502_p10, 1, 0 }
  0x12   : > { %s103_s23 = sshll.u32 %s435_s22, 4  ;;  %p257_p11 = pneg %p502_p10  ;;  %s104_s23 = int_to_ptr.vmem [resolvable:$true] %s103_s23 }
  0x13   : > { %s114_s25 = sshll.u32 %s436_s24, 4  ;;  %s307_s29 = scalar_lea.hbm %s620_s0, 128  ;;  %s514_s25 = int_to_ptr.vmem [resolvable:$true] %s114_s25 }
  0x14   : > { %p510_p12 = pnand %p623_p9, %p257_p11  ;;  %p308_p13 = scmp.ne.s32.totalorder %s620_s0, %s307_s29 }
  0x15   : > { %p314_p3 = scmp.lt.u32.totalorder %s307_s29, %s620_s0 }
  0x16   : > { %p309_p0 = pneg %p510_p12 }
  0x18   : > { %p310_p1 = pnand %p309_p0, %p308_p13 }
  0x1a   : > { %p311_p2 = pneg %p310_p1 }
  0x1c   : > { %p316_p4 = pnand %p314_p3, %p311_p2 }
  0x1e   : > { %319 = shalt.err (!%p316_p4)
}
  0x1f   : > { %s320_s6 = scalar_lea.vmem %s104_s23, 128  ;;  %p328_p9 = scmp.lt.s32.totalorder %s104_s23, %s104_s23 }
  0x20   : > { %p321_p7 = scmp.ne.s32.totalorder %s104_s23, %s320_s6  ;;  %p329_p6 = scmp.lt.s32.totalorder %s320_s6, %s320_s6 }
  0x22   : > { %p323_p8 = pnand %p321_p7, %p309_p0  ;;  %p330_p5 = por %p329_p6, %p328_p9 }
  0x24   : > { %p324_p11 = pneg %p323_p8 }
  0x26   : > { %p331_p10 = pnand %p330_p5, %p324_p11 }
  0x28   : > { %334 = shalt.err (!%p331_p10)
}
  0x29   : > { %260 = dma.hbm_to_vmem [thread:$0]  (!%p510_p12), %s620_s0, 128, %s104_s23, [#allocation3]  }
  0x2a   : > { %s335_s17 = scalar_lea.hbm %s621_s1, 128 }
  0x2b   : > { %p336_p13 = scmp.ne.s32.totalorder %s621_s1, %s335_s17  ;;  %p342_p9 = scmp.lt.u32.totalorder %s335_s17, %s621_s1 }
  0x2d   : > { %p338_p6 = pnand %p336_p13, %p309_p0 }
  0x2f   : > { %p339_p5 = pneg %p338_p6 }
  0x31   : > { %p344_p10 = pnand %p342_p9, %p339_p5 }
  0x33   : > { %347 = shalt.err (!%p344_p10)
}
  0x34   : > { %s348_s23 = scalar_lea.vmem %s514_s25, 128  ;;  %p356_p4 = scmp.lt.s32.totalorder %s514_s25, %s514_s25 }
  0x35   : > { %p349_p1 = scmp.ne.s32.totalorder %s514_s25, %s348_s23  ;;  %p357_p7 = scmp.lt.s32.totalorder %s348_s23, %s348_s23 }
  0x37   : > { %p351_p2 = pnand %p349_p1, %p309_p0  ;;  %p358_p8 = por %p357_p7, %p356_p4 }
  0x39   : > { %p352_p3 = pneg %p351_p2 }
  0x3b   : > { %p359_p11 = pnand %p358_p8, %p352_p3 }
  0x3d   : > { %362 = shalt.err (!%p359_p11)
}
  0x3e   : > { %263 = dma.hbm_to_vmem [thread:$0]  (!%p510_p12), %s621_s1, 128, %s514_s25, [#allocation6]  }
  0x3f   : > { %p630_p13 = scmp.ne.s32.totalorder %s628_s21, 0 }
  0x40   : > { %p631_p6 = scmp.eq.s32.totalorder (!%p630_p13), %s474_s13, 0 }
  0x41   : > { %127 = sbr.rel (%p630_p13) target bundleno = 103 (0x67), region = 28 }
  0x48   : > { %408 = dma.done.wait (%p631_p6), [#allocation3], 128   ;;  %p632_p0 = pmov %p631_p6 }
  0x4a   : > { %410 = vsyncadd (%p632_p0), [#allocation3], 4294967168  ;;  %p633_p5 = pmov %p632_p0 }
  0x4b   : > { %p634_p9 = pmov %p632_p0 }
  0x4c   : > { %412 = dma.done.wait (%p633_p5), [#allocation6], 128  }
  0x4d   : > { %414 = vsyncadd (%p634_p9), [#allocation6], 4294967168  ;;  %s145_s26 = sand.u32 1, %s425_s10   ;;  %s244_s4 = sshll.u32 %s474_s13, 7  ;;  %v148_v0 = vld [vmem:[#allocation2] sm:$0xff]  ;;  %v149_v1 = vld [vmem:[#allocation5] sm:$0xff] }
  0x4e   : > { %s242_s25 = sshll.u32 %s145_s26, 3  ;;  %v150_v2 = vadd.f32 %v149_v1, %v148_v0  ;;  %s580_s7 = scalar_lea.hbm %s622_s2, %s244_s4 }
  0x4f   : > { %s147_s3 = scalar_lea.vmem [#allocation7], %s242_s25  ;;  %s153_s8 = scalar_lea.sflag [#allocation4], %s145_s26 }
  0x50   : > { %s166_s21 = sshll.u32 %s147_s3, 4  ;;  %151 = vst [vmem:[%s147_s3] sm:$0xff] %v150_v2  ;;  %p635_p10 = scmp.ne.s32.totalorder %s626_s19, 0  ;;  %s575_s21 = int_to_ptr.vmem [resolvable:$true] %s166_s21 }
  0x51   : > { %s363_s14 = scalar_lea.vmem %s575_s21, 128  ;;  %s437_s13 = smov [#allocation7]  }
  0x52   : > { %p364_p12 = scmp.ne.s32.totalorder %s575_s21, %s363_s14  ;;  %s367_s16 = sshll.u32 %s437_s13, 4  ;;  %s368_s16 = int_to_ptr.vmem [resolvable:$false] %s367_s16 }
  0x53   : > { %s369_s17 = scalar_lea.vmem %s368_s16, 256  ;;  %p370_p3 = scmp.lt.s32.totalorder %s575_s21, %s368_s16 }
  0x54   : > { %p365_p1 = pnand %p364_p12, %p635_p10  ;;  %p371_p4 = scmp.lt.s32.totalorder %s369_s17, %s363_s14 }
  0x56   : > { %p366_p2 = pneg %p365_p1  ;;  %p372_p7 = por %p371_p4, %p370_p3 }
  0x58   : > { %p373_p8 = pnand %p372_p7, %p366_p2 }
  0x5a   : > { %376 = shalt.err (!%p373_p8)
}
  0x5b   : > { %s377_s22 = scalar_lea.hbm %s580_s7, 128  ;;  %s381_s28 = scalar_lea.hbm %s622_s2, 256 }
  0x5c   : > { %p378_p11 = scmp.ne.s32.totalorder %s580_s7, %s377_s22  ;;  %p382_p0 = scmp.lt.u32.totalorder %s580_s7, %s622_s2 }
  0x5d   : > { %p383_p5 = scmp.lt.u32.totalorder %s381_s28, %s377_s22  ;;  %p385_p12 = scmp.lt.u32.totalorder %s377_s22, %s580_s7 }
  0x5e   : > { %p379_p13 = pnand %p378_p11, %p635_p10 }
  0x5f   : > { %p384_p9 = por %p383_p5, %p382_p0 }
  0x60   : > { %p380_p6 = pneg %p379_p13 }
  0x61   : > { %p386_p1 = por %p385_p12, %p384_p9 }
  0x63   : > { %p387_p2 = pnand %p386_p1, %p380_p6 }
  0x65   : > { %390 = shalt.err (!%p387_p2)
}
  0x66   : > { %255 = dma.vmem_to_hbm [thread:$0]  (%p635_p10), %s575_s21, 128, %s580_s7, %s153_s8  }
  0x67 PF: > { %p272_p3 = scmp.ge.s32.totalorder %s433_s12, 2  ;;  %s178_s30 = sand.u32 1, %s421_s9  }
  0x68   : > { %p636_p4 = scmp.ne.s32.totalorder %s627_s20, 0  ;;  %s179_s26 = scalar_lea.sflag [#allocation4], %s178_s30 }
  0x6a   : > { %p265_p7 = pnand %p272_p3, %p636_p4 }
  0x6c   : > { %416 = dma.done.wait (!%p265_p7), %s179_s26, 128  }
  0x6d   : > { %418 = vsyncadd (!%p265_p7), %s179_s26, 4294967168  ;;  %p14_p8 = scmp.ge.s32.totalorder %s478_s15, 4   ;;  %s637_s9 = smov %s425_s10 }
  0x6e   : > { %s638_s10 = smov %s429_s11  ;;  %s639_s11 = smov %s489_s18 }
  0x6f   : > { %s640_s12 = smov %s478_s15  ;;  %16 = sbr.rel (!%p14_p8) target bundleno = 5 (0x5), region = 69 }
  0x76   :  { %184 = vsyncpa [#allocation3], 1 }
  0x77   :  { %186 = vsyncpa [#allocation3 + $0x1], 1 }
  0x78   :  { %187 = vsyncpa [#allocation6], 1 }
  0x79   :  { %188 = vsyncpa [#allocation4], 1 }
  0x7a   :  { %190 = vsyncpa [#allocation4 + $0x1], 1 }

// kernel: tpu_custom_call.1
= control target key start
LH: loop header
LB: loop body
LE: loop exit
PB: predicated region body
PF: predicated region fallthrough
CT: control target
= control target key end

     0   :  { %10 = vsyncpa [#allocation3], 0  ;;  %s2225_s0 = inlined_call_operand.hbm [shape: f32[500,128], index: 0, kind: input, shape index: {}]   ;;  %s2226_s1 = inlined_call_operand.hbm [shape: bf16[128,256], index: 1, kind: input, shape index: {}]   ;;  %s2227_s2 = inlined_call_operand.vmem [shape: f32[1,256], index: 2, kind: input, shape index: {}]   ;;  %s2228_s3 = inlined_call_operand.hbm [shape: bf16[256,128], index: 3, kind: input, shape index: {}]   ;;  %s2229_s4 = inlined_call_operand.vmem [shape: f32[1,128], index: 4, kind: input, shape index: {}]   ;;  %s2230_s5 = inlined_call_operand.hbm [shape: f32[500,128], index: 5, kind: output, shape index: {}]  }
   0x1   :  { %12 = vsyncpa [#allocation3 + $0x1], 0 }
   0x2   :  { %13 = vsyncpa [#allocation6], 0 }
   0x3   :  { %14 = vsyncpa [#allocation4], 0 }
   0x4   :  { %16 = vsyncpa [#allocation4 + $0x1], 0  ;;  %s1783_s18 = smov 0   ;;  %s1785_s19 = smov 0  }
   0x5   :  { %s1787_s20 = smov 0   ;;  %s1789_s21 = smov 0  }
   0x6 LB: > { %s1804_s22 = sadd.s32 4294967295, %s1738_s21   ;;  %s1174_s23 = sadd.s32 4294967294, %s1738_s21   ;;  %s1738_s21 = sphi %s1789_s21, %s2252_s21   ;;  %s1734_s20 = sphi %s1787_s20, %s2251_s20   ;;  %s1730_s19 = sphi %s1785_s19, %s2250_s19   ;;  %s1726_s18 = sphi %s1783_s18, %s2249_s18  }
   0x7   : > { %s1808_s24 = sadd.s32 1, %s1738_s21   ;;  %s29_s25 = sadd.s32 1, %s1734_s20 }
   0x8   : > { %s26_s26 = ssub.s32 %s1738_s21, %s1808_s24  ;;  %p36_p0 = scmp.ne.s32.totalorder %s1734_s20, %s1730_s19 }
   0x9   : > { %p27_p1 = scmp.eq.s32.totalorder %s26_s26, 0  ;;  %p37_p2 = scmp.eq.s32.totalorder %s1738_s21, 0 }
   0xa   : > { %p42_p3 = scmp.ne.s32.totalorder %s1730_s19, %s1726_s18  ;;  %p2231_p4 = scmp.eq.s32.totalorder %s1804_s22, 0 }
   0xb   : > { %s1820_s27 = scalar_select %p27_p1, %s1734_s20, %s29_s25  }
   0xc   : > { %p1822_p5 = por %p37_p2, %p36_p0  ;;  %p1828_p6 = por %p2231_p4, %p42_p3 }
   0xd   : > { %2234 = sst [smem:[#allocation12_spill]] %s1820_s27  ;;  %p150_p7 = scmp.eq.s32.totalorder %s1804_s22, 1 }
   0xe   : > { %s2235_s28 = scalar_select %p1822_p5, 1, 0 }
   0xf   : > { %s2236_s29 = scalar_select %p1828_p6, 1, 0 }
  0x10   : > { %p156_p8 = scmp.eq.s32.totalorder %s1174_s23, 1  ;;  %p1175_p9 = scmp.ge.s32.totalorder %s1738_s21, 1 }
  0x11   : > { %p163_p10 = scmp.lt.s32.totalorder %s1738_s21, 3  ;;  %p1835_p11 = por %p150_p7, %p36_p0 }
  0x12   : > { %p1839_p12 = por %p156_p8, %p42_p3  ;;  %s1740_s8 = smov [#allocation5]  }
  0x13   : > { %s2237_s30 = scalar_select %p1835_p11, 1, 0 }
  0x14   : > { %s2238_s6 = scalar_select %p1839_p12, 1, 0 }
  0x15   : > { %p1843_p13 = pnand %p1175_p9, %p163_p10  ;;  %s175_s9 = sshll.u32 %s1740_s8, 4  ;;  %s176_s9 = int_to_ptr.vmem [resolvable:$true] %s175_s9 }
  0x16   : > { %s1741_s11 = smov [#allocation7]   ;;  %s1584_s15 = scalar_lea.hbm %s2226_s1, 2048 }
  0x17   : > { %s2239_s7 = scalar_select %p1843_p13, 1, 0 }
  0x18   : > { %p1357_p1 = pneg %p1843_p13  ;;  %s191_s12 = sshll.u32 %s1741_s11, 4  ;;  %s1855_s12 = int_to_ptr.vmem [resolvable:$true] %s191_s12 }
  0x19   : > { %p1585_p0 = scmp.ne.s32.totalorder %s2226_s1, %s1584_s15  ;;  %p1591_p9 = scmp.lt.u32.totalorder %s1584_s15, %s2226_s1 }
  0x1a   : > { %p1851_p2 = pnand %p1357_p1, %p2231_p4 }
  0x1c   : > { %p1586_p3 = pneg %p1851_p2 }
  0x1e   : > { %p1587_p7 = pnand %p1586_p3, %p1585_p0 }
  0x20   : > { %p1588_p8 = pneg %p1587_p7 }
  0x22   : > { %p1593_p10 = pnand %p1591_p9, %p1588_p8 }
  0x24   : > { %1596 = shalt.err (!%p1593_p10)
}
  0x25   : > { %s1597_s26 = scalar_lea.vmem %s176_s9, 2048  ;;  %p1605_p11 = scmp.lt.s32.totalorder %s176_s9, %s176_s9 }
  0x26   : > { %p1598_p1 = scmp.ne.s32.totalorder %s176_s9, %s1597_s26  ;;  %p1606_p6 = scmp.lt.s32.totalorder %s1597_s26, %s1597_s26 }
  0x28   : > { %p1600_p4 = pnand %p1598_p1, %p1586_p3  ;;  %p1607_p13 = por %p1606_p6, %p1605_p11 }
  0x2a   : > { %p1601_p12 = pneg %p1600_p4 }
  0x2c   : > { %p1608_p5 = pnand %p1607_p13, %p1601_p12 }
  0x2e   : > { %1611 = shalt.err (!%p1608_p5)
}
  0x2f   : > { %s1742_s8 = smov 128   ;;  %s1743_s11 = smov 8  }
  0x30   : > { %1360 = dma.hbm_to_vmem [thread:$0]  (!%p1851_p2), %s2226_s1, 2048, %s176_s9, [#allocation6], %s1742_s8, %s1742_s8, %s1743_s11  }
  0x31   : > { %s1612_s17 = scalar_lea.hbm %s2228_s3, 2048 }
  0x32   : > { %p1613_p4 = scmp.ne.s32.totalorder %s2228_s3, %s1612_s17  ;;  %p1619_p11 = scmp.lt.u32.totalorder %s1612_s17, %s2228_s3 }
  0x34   : > { %p1615_p5 = pnand %p1613_p4, %p1586_p3 }
  0x36   : > { %p1616_p6 = pneg %p1615_p5 }
  0x38   : > { %p1621_p12 = pnand %p1619_p11, %p1616_p6 }
  0x3a   : > { %1624 = shalt.err (!%p1621_p12)
}
  0x3b   : > { %s1625_s9 = scalar_lea.vmem %s1855_s12, 2048  ;;  %p1633_p8 = scmp.lt.s32.totalorder %s1855_s12, %s1855_s12 }
  0x3c   : > { %p1626_p13 = scmp.ne.s32.totalorder %s1855_s12, %s1625_s9  ;;  %p1634_p9 = scmp.lt.s32.totalorder %s1625_s9, %s1625_s9 }
  0x3e   : > { %p1628_p0 = pnand %p1626_p13, %p1586_p3  ;;  %p1635_p10 = por %p1634_p9, %p1633_p8 }
  0x40   : > { %p1629_p7 = pneg %p1628_p0 }
  0x42   : > { %p1636_p1 = pnand %p1635_p10, %p1629_p7 }
  0x44   : > { %1639 = shalt.err (!%p1636_p1)
}
  0x45   : > { %s1744_s27 = smov 64   ;;  %s1745_s8 = smov 4  }
  0x46   : > { %1363 = dma.hbm_to_vmem [thread:$0]  (!%p1851_p2), %s2228_s3, 2048, %s1855_s12, [#allocation6], %s1744_s27, %s1744_s27, %s1745_s8  }
  0x47   : > { %p1178_p4 = scmp.ge.s32.totalorder %s1738_s21, 2 }
  0x48   : > { %p2241_p3 = scmp.ne.s32.totalorder (!%p1178_p4), %s2235_s28, 0 }
  0x49   : > { %204 = sbr.rel (%p1178_p4) target bundleno = 115 (0x73), region = 32 }
  0x50   : > { %207 = sbr.rel (!%p2241_p3) target bundleno = 115 (0x73), region = 36  ;;  %s208_s14 = sand.u32 (%p2241_p3), 1, %s1734_s20  }
  0x51   : > { %s1180_s15 = sshll.u32 (%p2241_p3), %s1738_s21, 5  ;;  %s1179_s16 = sshll.u32 (%p2241_p3), %s208_s14, 8 }
  0x52   : > { %s214_s17 = ssub.s32 (%p2241_p3), 63, %s1180_s15  ;;  %s1914_s23 = scalar_lea.sflag (%p2241_p3), [#allocation3], %s208_s14 }
  0x53   : > { %p215_p5 = scmp.lt.s32.totalorder (%p2241_p3), %s214_s17, 32  ;;  %s212_s25 = scalar_lea.vmem (%p2241_p3), [#allocation2], %s1179_s16 }
  0x57   : > { %s2254_s17 = smov (!%p215_p5, %s214_s17), 32 }
  0x58   : > { %s1911_s10 = sshll.u32 %s2254_s17, 7 }
  0x59   : > { %s219_s12 = ssub.s32 4096, %s1911_s10 }
  0x5a   : > { %220 = vsyncadd %s1914_s23, %s219_s12  ;;  %p1182_p2 = scmp.ne.s32.totalorder %s1911_s10, 0  ;;  %s1233_s28 = sshll.u32 %s1738_s21, 12 }
  0x5b   : > { %s1922_s27 = scalar_lea.hbm %s2225_s0, %s1233_s28  ;;  %s225_s8 = sshll.u32 %s212_s25, 4  ;;  %s1924_s8 = int_to_ptr.vmem [resolvable:$true] %s225_s8 }
  0x5c   : > { %s1640_s11 = scalar_lea.hbm %s1922_s27, %s1911_s10  ;;  %s1644_s15 = scalar_lea.hbm %s2225_s0, 8064 }
  0x5d   : > { %p1641_p6 = scmp.ne.s32.totalorder %s1922_s27, %s1640_s11  ;;  %p1645_p13 = scmp.lt.u32.totalorder %s1922_s27, %s2225_s0 }
  0x5e   : > { %p1646_p0 = scmp.lt.u32.totalorder %s1644_s15, %s1640_s11  ;;  %p1648_p8 = scmp.lt.u32.totalorder %s1640_s11, %s1922_s27 }
  0x5f   : > { %p1642_p11 = pnand %p1641_p6, %p1182_p2 }
  0x60   : > { %p1647_p7 = por %p1646_p0, %p1645_p13 }
  0x61   : > { %p1643_p12 = pneg %p1642_p11 }
  0x62   : > { %p1649_p9 = por %p1648_p8, %p1647_p7 }
  0x64   : > { %p1650_p10 = pnand %p1649_p9, %p1643_p12 }
  0x66   : > { %1653 = shalt.err (!%p1650_p10)
}
  0x67   : > { %s1654_s12 = scalar_lea.vmem %s1924_s8, %s1911_s10  ;;  %s1746_s25 = smov [#allocation2]  }
  0x68   : > { %p1655_p1 = scmp.ne.s32.totalorder %s1924_s8, %s1654_s12  ;;  %s1658_s28 = sshll.u32 %s1746_s25, 4  ;;  %s1659_s28 = int_to_ptr.vmem [resolvable:$false] %s1658_s28 }
  0x69   : > { %s1660_s26 = scalar_lea.vmem %s1659_s28, 8192  ;;  %p1661_p6 = scmp.lt.s32.totalorder %s1924_s8, %s1659_s28 }
  0x6a   : > { %p1656_p3 = pnand %p1655_p1, %p1182_p2  ;;  %p1662_p11 = scmp.lt.s32.totalorder %s1660_s26, %s1654_s12 }
  0x6c   : > { %p1657_p5 = pneg %p1656_p3  ;;  %p1663_p13 = por %p1662_p11, %p1661_p6 }
  0x6e   : > { %p1664_p0 = pnand %p1663_p13, %p1657_p5 }
  0x70   : > { %1667 = shalt.err (!%p1664_p0)
}
  0x71   : > { %s1747_s9 = smov 128   ;;  %s1748_s11 = smov 8  }
  0x72   : > { %231 = dma.hbm_to_vmem [thread:$0]  (%p1182_p2), %s1922_s27, %s1911_s10, %s1924_s8, %s1914_s23, %s1747_s9, %s1747_s9, %s1748_s11  }
  0x73 PF: > { %p2242_p12 = scmp.ne.s32.totalorder %s2239_s7, 0 }
  0x74   : > { %s1954_s13 = sand.u32 (!%p2242_p12), 1, %s1730_s19   ;;  %p2243_p7 = scmp.ne.s32.totalorder (!%p2242_p12), %s2236_s29, 0 }
  0x75   : > { %237 = sbr.rel (%p2242_p12) target bundleno = 760 (0x2f8), region = 40  ;;  %s1187_s14 = sshll.u32 (!%p2242_p12), %s1954_s13, 8 }
  0x76   : > { %s240_s15 = scalar_lea.sflag (!%p2242_p12), [#allocation3], %s1954_s13  ;;  %s1960_s16 = scalar_lea.vmem (!%p2242_p12), [#allocation2], %s1187_s14 }
  0x7c   : > { %1713 = dma.done.wait (%p2243_p7), %s240_s15, 4096  }
  0x7d   : > { %1715 = vsyncadd (%p2243_p7), %s240_s15, 4294963200  ;;  %p2244_p2 = scmp.eq.s32.totalorder %s1804_s22, 0 }
  0x7f   : > { %1717 = dma.done.wait (%p2244_p2), [#allocation6], 4096   ;;  %p2245_p8 = pmov %p2244_p2 }
  0x80   : > { %v1749_v0 = vmov 0   ;;  %v1416_v1 = vld [vmem:[#allocation5 + $0x4] ss:$8 sps:$4 sm:$0xff]   ;;  %v1418_v2 = vld [vmem:[#allocation5] ss:$8 sps:$4 sm:$0xff]   ;;  %v1444_v24 = vld [vmem:[#allocation7 + $0x50] sm:$0xff]  }
  0x81   : > { %1719 = vsyncadd (%p2245_p8), [#allocation6], 4294963200  ;;  %477 = vmatprep.mubr.bf16.mxu0 %v1749_v0  ;;  %445 = vmatprep.subr.bf16.mxu0 %v1416_v1  ;;  %v1419_v3 = vld [vmem:[#allocation5 + $0x14] ss:$8 sps:$4 sm:$0xff]   ;;  %v1421_v4 = vld [vmem:[#allocation5 + $0x10] ss:$8 sps:$4 sm:$0xff]  }
  0x82   : > { %446 = vmatpush1.bf16.msra.mxu0 %v1418_v2  ;;  %v1422_v5 = vld [vmem:[#allocation5 + $0x24] ss:$8 sps:$4 sm:$0xff]   ;;  %v1424_v6 = vld [vmem:[#allocation5 + $0x20] ss:$8 sps:$4 sm:$0xff]   ;;  %v1425_v7 = vld [vmem:[#allocation5 + $0x34] ss:$8 sps:$4 sm:$0xff]  }
  0x83   : > { %447 = vmatprep.subr.bf16.mxu0 %v1419_v3  ;;  %v1427_v8 = vld [vmem:[#allocation5 + $0x30] ss:$8 sps:$4 sm:$0xff]   ;;  %v1428_v9 = vld [vmem:[#allocation5 + $0x44] ss:$8 sps:$4 sm:$0xff]   ;;  %v1430_v10 = vld [vmem:[#allocation5 + $0x40] ss:$8 sps:$4 sm:$0xff]  }
  0x84   : > { %v1431_v11 = vld [vmem:[#allocation5 + $0x54] ss:$8 sps:$4 sm:$0xff]   ;;  %v1433_v12 = vld [vmem:[#allocation5 + $0x50] ss:$8 sps:$4 sm:$0xff]   ;;  %v1434_v13 = vld [vmem:[#allocation5 + $0x64] ss:$8 sps:$4 sm:$0xff]  }
  0x85   : > { %v1436_v14 = vld [vmem:[#allocation5 + $0x60] ss:$8 sps:$4 sm:$0xff]   ;;  %v1437_v15 = vld [vmem:[#allocation5 + $0x74] ss:$8 sps:$4 sm:$0xff]   ;;  %v1439_v19 = vld [vmem:[#allocation5 + $0x70] ss:$8 sps:$4 sm:$0xff]  }
  0x86   : > { %448 = vmatpush1.bf16.msra.mxu0 %v1421_v4  ;;  %v1440_v16 = vld [vmem:[#allocation7 + $0x40] sm:$0xff]   ;;  %v1442_v18 = vld [vmem:[#allocation7 + $0x48] sm:$0xff]   ;;  %v1445_v25 = vld [vmem:[#allocation7 + $0x10] sm:$0xff]   ;;  %s2097_s27 = scalar_lea.vmem [#allocation8], %s1187_s14  ;;  %s1063_s8 = scalar_lea.sflag [#allocation4], %s1954_s13 }
  0x87   : > { %449 = vmatprep.subr.bf16.mxu0 %v1422_v5  ;;  %v1441_v17 = vld [vmem:[#allocation7] sm:$0xff]   ;;  %v290_v21 = vld [vmem:[%s1960_s16 + $0x8] sm:$0xff]  ;;  %1235 = vmatprep.subr.bf16.mxu1 %v1440_v16  ;;  %v291_v26 = vld [vmem:[%s1960_s16 + $0x10] sm:$0xff]  ;;  %p2246_p9 = scmp.ne.s32.totalorder %s2237_s30, 0 }
  0x88   : > { %v289_v20 = vld [vmem:[%s1960_s16] sm:$0xff]  ;;  %v1443_v22 = vld [vmem:[#allocation7 + $0x8] sm:$0xff]   ;;  %1236 = vmatpush3.bf16.msra.mxu1 %v1441_v17  ;;  %v292_v27 = vld [vmem:[%s1960_s16 + $0x18] sm:$0xff]  ;;  %s1225_s17 = sshll.u32 (%p2246_p9), %s1804_s22, 5 }
  0x89   : > { %v321_v23 = vpack.c.bf16 %v290_v21, %v289_v20  ;;  %1237 = vmatprep.subr.bf16.mxu1 %v1442_v18  ;;  %v322_v28 = vpack.c.bf16 %v292_v27, %v291_v26  ;;  %v293_v29 = vld [vmem:[%s1960_s16 + $0x20] sm:$0xff]  ;;  %v294_v30 = vld [vmem:[%s1960_s16 + $0x28] sm:$0xff]  ;;  %v295_v32 = vld [vmem:[%s1960_s16 + $0x30] sm:$0xff]  ;;  %v355_v18 = vlaneseq  ;;  %s1071_s12 = ssub.s32 (%p2246_p9), 63, %s1225_s17 }
  0x8a   : > { %450 = vmatpush1.bf16.msra.mxu0 %v1424_v6  ;;  %v323_v31 = vpack.c.bf16 %v294_v30, %v293_v29  ;;  %v296_v33 = vld [vmem:[%s1960_s16 + $0x38] sm:$0xff]  ;;  %v297_v35 = vld [vmem:[%s1960_s16 + $0x40] sm:$0xff]  ;;  %v298_v36 = vld [vmem:[%s1960_s16 + $0x48] sm:$0xff]  ;;  %p1072_p10 = scmp.lt.s32.totalorder (%p2246_p9), %s1071_s12, 32 }
  0x8b   : > { %451 = vmatprep.subr.bf16.mxu0 %v1425_v7  ;;  %v324_v34 = vpack.c.bf16 %v296_v33, %v295_v32  ;;  %v325_v37 = vpack.c.bf16 %v298_v36, %v297_v35  ;;  %v299_v38 = vld [vmem:[%s1960_s16 + $0x50] sm:$0xff]  ;;  %v300_v39 = vld [vmem:[%s1960_s16 + $0x58] sm:$0xff]  ;;  %v301_v41 = vld [vmem:[%s1960_s16 + $0x60] sm:$0xff] }
  0x8c   : > { %1238 = vmatpush3.bf16.msra.mxu1 %v1443_v22  ;;  %v326_v40 = vpack.c.bf16 %v300_v39, %v299_v38  ;;  %v302_v42 = vld [vmem:[%s1960_s16 + $0x68] sm:$0xff]  ;;  %v303_v44 = vld [vmem:[%s1960_s16 + $0x70] sm:$0xff]  ;;  %v304_v45 = vld [vmem:[%s1960_s16 + $0x78] sm:$0xff] }
  0x8d   : > { %1239 = vmatprep.subr.bf16.mxu1 %v1444_v24  ;;  %v327_v43 = vpack.c.bf16 %v302_v42, %v301_v41  ;;  %v328_v46 = vpack.c.bf16 %v304_v45, %v303_v44  ;;  %v305_v47 = vld [vmem:[%s1960_s16 + $0x80] sm:$0xff]  ;;  %v306_v48 = vld [vmem:[%s1960_s16 + $0x88] sm:$0xff]  ;;  %v307_v50 = vld [vmem:[%s1960_s16 + $0x90] sm:$0xff] }
  0x8e   : > { %452 = vmatpush1.bf16.msra.mxu0 %v1427_v8  ;;  %v329_v49 = vpack.c.bf16 %v306_v48, %v305_v47  ;;  %v308_v51 = vld [vmem:[%s1960_s16 + $0x98] sm:$0xff]  ;;  %v309_v53 = vld [vmem:[%s1960_s16 + $0xa0] sm:$0xff]  ;;  %v310_v54 = vld [vmem:[%s1960_s16 + $0xa8] sm:$0xff] }
  0x8f   : > { %453 = vmatprep.subr.bf16.mxu0 %v1428_v9  ;;  %v330_v52 = vpack.c.bf16 %v308_v51, %v307_v50  ;;  %v331_v55 = vpack.c.bf16 %v310_v54, %v309_v53  ;;  %v311_v56 = vld [vmem:[%s1960_s16 + $0xb0] sm:$0xff]  ;;  %v312_v57 = vld [vmem:[%s1960_s16 + $0xb8] sm:$0xff]  ;;  %v1448_v61 = vld [vmem:[#allocation7 + $0x60] sm:$0xff]  }
  0x90   : > { %1240 = vmatpush3.bf16.msra.mxu1 %v1445_v25  ;;  %v1446_v58 = vld [vmem:[#allocation7 + $0x58] sm:$0xff]   ;;  %v332_v60 = vpack.c.bf16 %v312_v57, %v311_v56  ;;  %v1449_v62 = vld [vmem:[#allocation7 + $0x20] sm:$0xff]   ;;  %v314_v1 = vld [vmem:[%s1960_s16 + $0xc8] sm:$0xff] }
  0x91   : > { %v1447_v59 = vld [vmem:[#allocation7 + $0x18] sm:$0xff]   ;;  %1241 = vmatprep.subr.bf16.mxu1 %v1446_v58  ;;  %v313_v63 = vld [vmem:[%s1960_s16 + $0xc0] sm:$0xff]  ;;  %v1450_v2 = vld [vmem:[#allocation7 + $0x68] sm:$0xff]  }
  0x92   : > { %454 = vmatpush1.bf16.msra.mxu0 %v1430_v10  ;;  %v1451_v3 = vld [vmem:[#allocation7 + $0x28] sm:$0xff]   ;;  %v333_v4 = vpack.c.bf16 %v314_v1, %v313_v63  ;;  %v1452_v5 = vld [vmem:[#allocation7 + $0x70] sm:$0xff]   ;;  %v316_v8 = vld [vmem:[%s1960_s16 + $0xd8] sm:$0xff] }
  0x93   : > { %455 = vmatprep.subr.bf16.mxu0 %v1431_v11  ;;  %v1453_v6 = vld [vmem:[#allocation7 + $0x30] sm:$0xff]   ;;  %v1454_v9 = vld [vmem:[#allocation7 + $0x78] sm:$0xff]   ;;  %v353_v21 = vld [vmem:[%s2227_s2] sm:$0x3] }
  0x94   : > { %1242 = vmatpush3.bf16.msra.mxu1 %v1447_v59  ;;  %v315_v7 = vld [vmem:[%s1960_s16 + $0xd0] sm:$0xff]  ;;  %v1455_v10 = vld [vmem:[#allocation7 + $0x38] sm:$0xff]  }
  0x95   : > { %1243 = vmatprep.subr.bf16.mxu1 %v1448_v61  ;;  %v334_v11 = vpack.c.bf16 %v316_v8, %v315_v7  ;;  %v320_v16 = vld [vmem:[%s1960_s16 + $0xf8] sm:$0xff] }
  0x96   : > { %456 = vmatpush1.bf16.msra.mxu0 %v1433_v12  ;;  %v317_v12 = vld [vmem:[%s1960_s16 + $0xe0] sm:$0xff] }
  0x97   : > { %457 = vmatprep.subr.bf16.mxu0 %v1434_v13  ;;  %v318_v13 = vld [vmem:[%s1960_s16 + $0xe8] sm:$0xff] }
  0x98   : > { %1244 = vmatpush3.bf16.msra.mxu1 %v1449_v62 }
  0x99   : > { %1245 = vmatprep.subr.bf16.mxu1 %v1450_v2 }
  0x9a   : > { %458 = vmatpush1.bf16.msra.mxu0 %v1436_v14  ;;  %v335_v14 = vpack.c.bf16 %v318_v13, %v317_v12 }
  0x9b   : > { %459 = vmatprep.subr.bf16.mxu0 %v1437_v15  ;;  %v319_v15 = vld [vmem:[%s1960_s16 + $0xf0] sm:$0xff] }
  0x9c   : > { %1246 = vmatpush3.bf16.msra.mxu1 %v1451_v3  ;;  %v336_v17 = vpack.c.bf16 %v320_v16, %v319_v15 }
  0x9d   : > { %1247 = vmatprep.subr.bf16.mxu1 %v1452_v5 }
  0x9e   : > { %460 = vmatpush1.bf16.msra.mxu0 %v1439_v19  ;;  %v356_v19 = vshrl.u32 %v355_v18, 7 }
  0xa0   : > { %1248 = vmatpush3.bf16.msra.mxu1 %v1453_v6  ;;  %v357_v20 = vsub.s32 0, %v356_v19  ;;  %v361_v22 = vsub.s32 1, %v356_v19 }
  0xa1   : > { %478 = vmatmul.mubr.bf16.vlgmr.msra.gmra.mrb[0].mxu0 %v321_v23  ;;  %1249 = vmatprep.subr.bf16.mxu1 %v1454_v9 }
  0xa2   : > { %487 = vmatprep.mubr.bf16.mxu0 %v1749_v0  ;;  %v2021_v23 = vrot.slane %v353_v21, %v357_v20  ;;  %v2023_v24 = vrot.slane %v353_v21, %v361_v22 }
  0xa4   : > { %1250 = vmatpush3.bf16.msra.mxu1 %v1455_v10 }
  0xa9   : > { %488 = vmatmul.mubr.bf16.gmra.mrb[4].mxu0 %v322_v28 }
  0xaa   : > { %497 = vmatprep.mubr.bf16.mxu0 %v1749_v0 }
  0xb1   : > { %498 = vmatmul.mubr.bf16.gmra.mrb[8].mxu0 %v323_v31 }
  0xb2   : > { %507 = vmatprep.mubr.bf16.mxu0 %v1749_v0 }
  0xb9   : > { %508 = vmatmul.mubr.bf16.gmra.mrb[12].mxu0 %v324_v34 }
  0xba   : > { %517 = vmatprep.mubr.bf16.mxu0 %v1749_v0 }
  0xc1   : > { %518 = vmatmul.mubr.bf16.gmra.mrb[16].mxu0 %v325_v37 }
  0xc2   : > { %527 = vmatprep.mubr.bf16.mxu0 %v1749_v0 }
  0xc9   : > { %528 = vmatmul.mubr.bf16.gmra.mrb[20].mxu0 %v326_v40 }
  0xca   : > { %537 = vmatprep.mubr.bf16.mxu0 %v1749_v0 }
  0xd1   : > { %538 = vmatmul.mubr.bf16.gmra.mrb[24].mxu0 %v327_v43 }
  0xd2   : > { %547 = vmatprep.mubr.bf16.mxu0 %v1749_v0 }
  0xd9   : > { %548 = vmatmul.mubr.bf16.gmra.mrb[28].mxu0 %v328_v46 }
  0xda   : > { %557 = vmatprep.mubr.bf16.mxu0 %v1749_v0 }
  0xe1   : > { %558 = vmatmul.mubr.bf16.gmra.mrb[32].mxu0 %v329_v49 }
  0xe2   : > { %567 = vmatprep.mubr.bf16.mxu0 %v1749_v0 }
  0xe9   : > { %568 = vmatmul.mubr.bf16.gmra.mrb[36].mxu0 %v330_v52 }
  0xea   : > { %577 = vmatprep.mubr.bf16.mxu0 %v1749_v0 }
  0xf1   : > { %578 = vmatmul.mubr.bf16.gmra.mrb[40].mxu0 %v331_v55 }
  0xf2   : > { %587 = vmatprep.mubr.bf16.mxu0 %v1749_v0 }
  0xf9   : > { %588 = vmatmul.mubr.bf16.gmra.mrb[44].mxu0 %v332_v60 }
  0xfa   : > { %597 = vmatprep.mubr.bf16.mxu0 %v1749_v0 }
 0x101   : > { %598 = vmatmul.mubr.bf16.gmra.mrb[48].mxu0 %v333_v4 }
 0x102   : > { %607 = vmatprep.mubr.bf16.mxu0 %v1749_v0 }
 0x109   : > { %608 = vmatmul.mubr.bf16.gmra.mrb[52].mxu0 %v334_v11 }
 0x10a   : > { %617 = vmatprep.mubr.bf16.mxu0 %v1749_v0 }
 0x111   : > { %618 = vmatmul.mubr.bf16.gmra.mrb[56].mxu0 %v335_v14 }
 0x112   : > { %627 = vmatprep.mubr.bf16.mxu0 %v1749_v0 }
 0x119   : > { %628 = vmatmul.mubr.bf16.gmra.mrb[60].mxu0 %v336_v17 }
 0x174   : > { %v479_v25 = vpop.f32.mrb[0].mxu0 }
 0x175   : > { %v480_v26 = vadd.f32 %v479_v25, %v2021_v23  ;;  %v481_v0 = vpop.f32.mrb[1].mxu0 }
 0x176   : > { %v482_v27 = vadd.f32 %v481_v0, %v2023_v24  ;;  %v483_v28 = vpop.f32.mrb[2].mxu0 }
 0x177   : > { %1456 = vtanh.f32 %v480_v26  ;;  %v484_v29 = vadd.f32 %v483_v28, %v2021_v23  ;;  %v485_v30 = vpop.f32.mrb[3].mxu0 }
 0x178   : > { %1458 = vtanh.f32 %v482_v27  ;;  %v486_v31 = vadd.f32 %v485_v30, %v2023_v24 }
 0x179   : > { %1460 = vtanh.f32 %v484_v29 }
 0x17a   : > { %1462 = vtanh.f32 %v486_v31 }
 0x17c   : > { %v489_v32 = vpop.f32.mrb[4].mxu0 }
 0x17d   : > { %v490_v33 = vadd.f32 %v489_v32, %v2021_v23  ;;  %v491_v34 = vpop.f32.mrb[5].mxu0 }
 0x17e   : > { %v492_v35 = vadd.f32 %v491_v34, %v2023_v24  ;;  %v493_v36 = vpop.f32.mrb[6].mxu0 }
 0x17f   : > { %1464 = vtanh.f32 %v490_v33  ;;  %v494_v37 = vadd.f32 %v493_v36, %v2021_v23  ;;  %v495_v38 = vpop.f32.mrb[7].mxu0 }
 0x180   : > { %1466 = vtanh.f32 %v492_v35  ;;  %v496_v39 = vadd.f32 %v495_v38, %v2023_v24 }
 0x181   : > { %v1457_v40 = vpop.eup %1456  ;;  %1468 = vtanh.f32 %v494_v37 }
 0x182   : > { %v1459_v41 = vpop.eup %1458  ;;  %1470 = vtanh.f32 %v496_v39 }
 0x183   : > { %v1461_v42 = vpop.eup %1460 }
 0x184   : > { %v1463_v43 = vpop.eup %1462  ;;  %v499_v44 = vpop.f32.mrb[8].mxu0  ;;  %v702_v45 = vpack.c.bf16 %v1461_v42, %v1457_v40 }
 0x185   : > { %v500_v46 = vadd.f32 %v499_v44, %v2021_v23  ;;  %v501_v47 = vpop.f32.mrb[9].mxu0  ;;  %v703_v48 = vpack.c.bf16 %v1463_v43, %v1459_v41 }
 0x186   : > { %v502_v49 = vadd.f32 %v501_v47, %v2023_v24  ;;  %v503_v50 = vpop.f32.mrb[10].mxu0 }
 0x187   : > { %1472 = vtanh.f32 %v500_v46  ;;  %v504_v51 = vadd.f32 %v503_v50, %v2021_v23  ;;  %v505_v52 = vpop.f32.mrb[11].mxu0  ;;  %901 = vmatprep.mubr.bf16.mxu1 %v703_v48 }
 0x188   : > { %1474 = vtanh.f32 %v502_v49  ;;  %v506_v53 = vadd.f32 %v505_v52, %v2023_v24  ;;  %902 = vmatmul.mubr.bf16.vlgmr.msra.gmra.mrb[0].mxu1 %v702_v45 }
 0x189   : > { %v1465_v54 = vpop.eup %1464  ;;  %1476 = vtanh.f32 %v504_v51 }
 0x18a   : > { %v1467_v55 = vpop.eup %1466  ;;  %1478 = vtanh.f32 %v506_v53 }
 0x18b   : > { %v1469_v56 = vpop.eup %1468 }
 0x18c   : > { %v1471_v57 = vpop.eup %1470  ;;  %v509_v58 = vpop.f32.mrb[12].mxu0  ;;  %v704_v59 = vpack.c.bf16 %v1469_v56, %v1465_v54 }
 0x18d   : > { %v510_v60 = vadd.f32 %v509_v58, %v2021_v23  ;;  %v511_v61 = vpop.f32.mrb[13].mxu0  ;;  %v705_v62 = vpack.c.bf16 %v1471_v57, %v1467_v55 }
 0x18e   : > { %v512_v63 = vadd.f32 %v511_v61, %v2023_v24  ;;  %v513_v1 = vpop.f32.mrb[14].mxu0 }
 0x18f   : > { %1480 = vtanh.f32 %v510_v60  ;;  %v514_v2 = vadd.f32 %v513_v1, %v2021_v23  ;;  %v515_v3 = vpop.f32.mrb[15].mxu0  ;;  %909 = vmatprep.mubr.bf16.mxu1 %v705_v62 }
 0x190   : > { %1482 = vtanh.f32 %v512_v63  ;;  %v516_v4 = vadd.f32 %v515_v3, %v2023_v24  ;;  %910 = vmatmul.mubr.bf16.gmra.mrb[4].mxu1 %v704_v59 }
 0x191   : > { %v1473_v5 = vpop.eup %1472  ;;  %1484 = vtanh.f32 %v514_v2 }
 0x192   : > { %v1475_v6 = vpop.eup %1474  ;;  %1486 = vtanh.f32 %v516_v4 }
 0x193   : > { %v1477_v7 = vpop.eup %1476 }
 0x194   : > { %v1479_v8 = vpop.eup %1478  ;;  %v519_v9 = vpop.f32.mrb[16].mxu0  ;;  %v706_v10 = vpack.c.bf16 %v1477_v7, %v1473_v5 }
 0x195   : > { %v520_v11 = vadd.f32 %v519_v9, %v2021_v23  ;;  %v521_v12 = vpop.f32.mrb[17].mxu0  ;;  %v707_v13 = vpack.c.bf16 %v1479_v8, %v1475_v6 }
 0x196   : > { %v522_v14 = vadd.f32 %v521_v12, %v2023_v24  ;;  %v523_v15 = vpop.f32.mrb[18].mxu0 }
 0x197   : > { %1488 = vtanh.f32 %v520_v11  ;;  %v524_v16 = vadd.f32 %v523_v15, %v2021_v23  ;;  %v525_v17 = vpop.f32.mrb[19].mxu0  ;;  %917 = vmatprep.mubr.bf16.mxu1 %v707_v13 }
 0x198   : > { %1490 = vtanh.f32 %v522_v14  ;;  %v526_v18 = vadd.f32 %v525_v17, %v2023_v24  ;;  %918 = vmatmul.mubr.bf16.gmra.mrb[8].mxu1 %v706_v10 }
 0x199   : > { %v1481_v19 = vpop.eup %1480  ;;  %1492 = vtanh.f32 %v524_v16 }
 0x19a   : > { %v1483_v20 = vpop.eup %1482  ;;  %1494 = vtanh.f32 %v526_v18 }
 0x19b   : > { %v1485_v21 = vpop.eup %1484 }
 0x19c   : > { %v1487_v22 = vpop.eup %1486  ;;  %v529_v25 = vpop.f32.mrb[20].mxu0  ;;  %v708_v26 = vpack.c.bf16 %v1485_v21, %v1481_v19 }
 0x19d   : > { %v530_v0 = vadd.f32 %v529_v25, %v2021_v23  ;;  %v531_v27 = vpop.f32.mrb[21].mxu0  ;;  %v709_v28 = vpack.c.bf16 %v1487_v22, %v1483_v20 }
 0x19e   : > { %v532_v29 = vadd.f32 %v531_v27, %v2023_v24  ;;  %v533_v30 = vpop.f32.mrb[22].mxu0 }
 0x19f   : > { %1496 = vtanh.f32 %v530_v0  ;;  %v534_v31 = vadd.f32 %v533_v30, %v2021_v23  ;;  %v535_v32 = vpop.f32.mrb[23].mxu0  ;;  %925 = vmatprep.mubr.bf16.mxu1 %v709_v28 }
 0x1a0   : > { %1498 = vtanh.f32 %v532_v29  ;;  %v536_v33 = vadd.f32 %v535_v32, %v2023_v24  ;;  %926 = vmatmul.mubr.bf16.gmra.mrb[12].mxu1 %v708_v26 }
 0x1a1   : > { %v1489_v34 = vpop.eup %1488  ;;  %1500 = vtanh.f32 %v534_v31 }
 0x1a2   : > { %v1491_v35 = vpop.eup %1490  ;;  %1502 = vtanh.f32 %v536_v33 }
 0x1a3   : > { %v1493_v36 = vpop.eup %1492 }
 0x1a4   : > { %v1495_v37 = vpop.eup %1494  ;;  %v539_v38 = vpop.f32.mrb[24].mxu0  ;;  %v710_v39 = vpack.c.bf16 %v1493_v36, %v1489_v34 }
 0x1a5   : > { %v540_v40 = vadd.f32 %v539_v38, %v2021_v23  ;;  %v541_v41 = vpop.f32.mrb[25].mxu0  ;;  %v711_v42 = vpack.c.bf16 %v1495_v37, %v1491_v35 }
 0x1a6   : > { %v542_v43 = vadd.f32 %v541_v41, %v2023_v24  ;;  %v543_v44 = vpop.f32.mrb[26].mxu0 }
 0x1a7   : > { %1504 = vtanh.f32 %v540_v40  ;;  %v544_v45 = vadd.f32 %v543_v44, %v2021_v23  ;;  %v545_v46 = vpop.f32.mrb[27].mxu0  ;;  %933 = vmatprep.mubr.bf16.mxu1 %v711_v42 }
 0x1a8   : > { %1506 = vtanh.f32 %v542_v43  ;;  %v546_v47 = vadd.f32 %v545_v46, %v2023_v24  ;;  %934 = vmatmul.mubr.bf16.gmra.mrb[16].mxu1 %v710_v39 }
 0x1a9   : > { %v1497_v48 = vpop.eup %1496  ;;  %1508 = vtanh.f32 %v544_v45 }
 0x1aa   : > { %v1499_v49 = vpop.eup %1498  ;;  %1510 = vtanh.f32 %v546_v47 }
 0x1ab   : > { %v1501_v50 = vpop.eup %1500 }
 0x1ac   : > { %v1503_v51 = vpop.eup %1502  ;;  %v549_v52 = vpop.f32.mrb[28].mxu0  ;;  %v712_v53 = vpack.c.bf16 %v1501_v50, %v1497_v48 }
 0x1ad   : > { %v550_v54 = vadd.f32 %v549_v52, %v2021_v23  ;;  %v551_v55 = vpop.f32.mrb[29].mxu0  ;;  %v713_v56 = vpack.c.bf16 %v1503_v51, %v1499_v49 }
 0x1ae   : > { %v552_v57 = vadd.f32 %v551_v55, %v2023_v24  ;;  %v553_v58 = vpop.f32.mrb[30].mxu0 }
 0x1af   : > { %1512 = vtanh.f32 %v550_v54  ;;  %v554_v59 = vadd.f32 %v553_v58, %v2021_v23  ;;  %v555_v60 = vpop.f32.mrb[31].mxu0  ;;  %941 = vmatprep.mubr.bf16.mxu1 %v713_v56 }
 0x1b0   : > { %1514 = vtanh.f32 %v552_v57  ;;  %v556_v61 = vadd.f32 %v555_v60, %v2023_v24  ;;  %942 = vmatmul.mubr.bf16.gmra.mrb[20].mxu1 %v712_v53 }
 0x1b1   : > { %v1505_v62 = vpop.eup %1504  ;;  %1516 = vtanh.f32 %v554_v59 }
 0x1b2   : > { %v1507_v63 = vpop.eup %1506  ;;  %1518 = vtanh.f32 %v556_v61 }
 0x1b3   : > { %v1509_v1 = vpop.eup %1508 }
 0x1b4   : > { %v1511_v2 = vpop.eup %1510  ;;  %v559_v3 = vpop.f32.mrb[32].mxu0  ;;  %v714_v4 = vpack.c.bf16 %v1509_v1, %v1505_v62 }
 0x1b5   : > { %v560_v5 = vadd.f32 %v559_v3, %v2021_v23  ;;  %v561_v6 = vpop.f32.mrb[33].mxu0  ;;  %v715_v7 = vpack.c.bf16 %v1511_v2, %v1507_v63 }
 0x1b6   : > { %v562_v8 = vadd.f32 %v561_v6, %v2023_v24  ;;  %v563_v9 = vpop.f32.mrb[34].mxu0 }
 0x1b7   : > { %1520 = vtanh.f32 %v560_v5  ;;  %v564_v10 = vadd.f32 %v563_v9, %v2021_v23  ;;  %v565_v11 = vpop.f32.mrb[35].mxu0  ;;  %949 = vmatprep.mubr.bf16.mxu1 %v715_v7 }
 0x1b8   : > { %1522 = vtanh.f32 %v562_v8  ;;  %v566_v12 = vadd.f32 %v565_v11, %v2023_v24  ;;  %950 = vmatmul.mubr.bf16.gmra.mrb[24].mxu1 %v714_v4 }
 0x1b9   : > { %v1513_v13 = vpop.eup %1512  ;;  %1524 = vtanh.f32 %v564_v10 }
 0x1ba   : > { %v1515_v14 = vpop.eup %1514  ;;  %1526 = vtanh.f32 %v566_v12 }
 0x1bb   : > { %v1517_v15 = vpop.eup %1516 }
 0x1bc   : > { %v1519_v16 = vpop.eup %1518  ;;  %v569_v17 = vpop.f32.mrb[36].mxu0  ;;  %v716_v18 = vpack.c.bf16 %v1517_v15, %v1513_v13 }
 0x1bd   : > { %v570_v19 = vadd.f32 %v569_v17, %v2021_v23  ;;  %v571_v20 = vpop.f32.mrb[37].mxu0  ;;  %v717_v21 = vpack.c.bf16 %v1519_v16, %v1515_v14 }
 0x1be   : > { %v572_v22 = vadd.f32 %v571_v20, %v2023_v24  ;;  %v573_v25 = vpop.f32.mrb[38].mxu0 }
 0x1bf   : > { %1528 = vtanh.f32 %v570_v19  ;;  %v574_v26 = vadd.f32 %v573_v25, %v2021_v23  ;;  %v575_v0 = vpop.f32.mrb[39].mxu0  ;;  %957 = vmatprep.mubr.bf16.mxu1 %v717_v21 }
 0x1c0   : > { %1530 = vtanh.f32 %v572_v22  ;;  %v576_v27 = vadd.f32 %v575_v0, %v2023_v24  ;;  %958 = vmatmul.mubr.bf16.gmra.mrb[28].mxu1 %v716_v18 }
 0x1c1   : > { %v1521_v28 = vpop.eup %1520  ;;  %1532 = vtanh.f32 %v574_v26 }
 0x1c2   : > { %v1523_v29 = vpop.eup %1522  ;;  %1534 = vtanh.f32 %v576_v27 }
 0x1c3   : > { %v1525_v30 = vpop.eup %1524 }
 0x1c4   : > { %v1527_v31 = vpop.eup %1526  ;;  %v579_v32 = vpop.f32.mrb[40].mxu0  ;;  %v718_v33 = vpack.c.bf16 %v1525_v30, %v1521_v28 }
 0x1c5   : > { %v580_v34 = vadd.f32 %v579_v32, %v2021_v23  ;;  %v581_v35 = vpop.f32.mrb[41].mxu0  ;;  %v719_v36 = vpack.c.bf16 %v1527_v31, %v1523_v29 }
 0x1c6   : > { %v582_v37 = vadd.f32 %v581_v35, %v2023_v24  ;;  %v583_v38 = vpop.f32.mrb[42].mxu0 }
 0x1c7   : > { %1536 = vtanh.f32 %v580_v34  ;;  %v584_v39 = vadd.f32 %v583_v38, %v2021_v23  ;;  %v585_v40 = vpop.f32.mrb[43].mxu0  ;;  %965 = vmatprep.mubr.bf16.mxu1 %v719_v36 }
 0x1c8   : > { %1538 = vtanh.f32 %v582_v37  ;;  %v586_v41 = vadd.f32 %v585_v40, %v2023_v24  ;;  %966 = vmatmul.mubr.bf16.gmra.mrb[32].mxu1 %v718_v33 }
 0x1c9   : > { %v1529_v42 = vpop.eup %1528  ;;  %1540 = vtanh.f32 %v584_v39 }
 0x1ca   : > { %v1531_v43 = vpop.eup %1530  ;;  %1542 = vtanh.f32 %v586_v41 }
 0x1cb   : > { %v1533_v44 = vpop.eup %1532 }
 0x1cc   : > { %v1535_v45 = vpop.eup %1534  ;;  %v589_v46 = vpop.f32.mrb[44].mxu0  ;;  %v720_v47 = vpack.c.bf16 %v1533_v44, %v1529_v42 }
 0x1cd   : > { %v590_v48 = vadd.f32 %v589_v46, %v2021_v23  ;;  %v591_v49 = vpop.f32.mrb[45].mxu0  ;;  %v721_v50 = vpack.c.bf16 %v1535_v45, %v1531_v43 }
 0x1ce   : > { %v592_v51 = vadd.f32 %v591_v49, %v2023_v24  ;;  %v593_v52 = vpop.f32.mrb[46].mxu0 }
 0x1cf   : > { %1544 = vtanh.f32 %v590_v48  ;;  %v594_v53 = vadd.f32 %v593_v52, %v2021_v23  ;;  %v595_v54 = vpop.f32.mrb[47].mxu0  ;;  %973 = vmatprep.mubr.bf16.mxu1 %v721_v50 }
 0x1d0   : > { %1546 = vtanh.f32 %v592_v51  ;;  %v596_v55 = vadd.f32 %v595_v54, %v2023_v24  ;;  %974 = vmatmul.mubr.bf16.gmra.mrb[36].mxu1 %v720_v47 }
 0x1d1   : > { %v1537_v56 = vpop.eup %1536  ;;  %1548 = vtanh.f32 %v594_v53 }
 0x1d2   : > { %v1539_v57 = vpop.eup %1538  ;;  %1550 = vtanh.f32 %v596_v55 }
 0x1d3   : > { %v1541_v58 = vpop.eup %1540 }
 0x1d4   : > { %v1543_v59 = vpop.eup %1542  ;;  %v599_v60 = vpop.f32.mrb[48].mxu0  ;;  %v722_v61 = vpack.c.bf16 %v1541_v58, %v1537_v56 }
 0x1d5   : > { %v600_v62 = vadd.f32 %v599_v60, %v2021_v23  ;;  %v601_v63 = vpop.f32.mrb[49].mxu0  ;;  %v723_v1 = vpack.c.bf16 %v1543_v59, %v1539_v57 }
 0x1d6   : > { %v602_v2 = vadd.f32 %v601_v63, %v2023_v24  ;;  %v603_v3 = vpop.f32.mrb[50].mxu0 }
 0x1d7   : > { %1552 = vtanh.f32 %v600_v62  ;;  %v604_v4 = vadd.f32 %v603_v3, %v2021_v23  ;;  %v605_v5 = vpop.f32.mrb[51].mxu0  ;;  %981 = vmatprep.mubr.bf16.mxu1 %v723_v1 }
 0x1d8   : > { %1554 = vtanh.f32 %v602_v2  ;;  %v606_v6 = vadd.f32 %v605_v5, %v2023_v24  ;;  %982 = vmatmul.mubr.bf16.gmra.mrb[40].mxu1 %v722_v61  ;;  %v2092_v61 = vld [vmem:[%s2229_s4] ss:$0 sm:$0xff] }
 0x1d9   : > { %v1545_v7 = vpop.eup %1544  ;;  %1556 = vtanh.f32 %v604_v4 }
 0x1da   : > { %v1547_v8 = vpop.eup %1546  ;;  %1558 = vtanh.f32 %v606_v6 }
 0x1db   : > { %v1549_v9 = vpop.eup %1548 }
 0x1dc   : > { %v1551_v10 = vpop.eup %1550  ;;  %v609_v11 = vpop.f32.mrb[52].mxu0  ;;  %v724_v12 = vpack.c.bf16 %v1549_v9, %v1545_v7 }
 0x1dd   : > { %v610_v13 = vadd.f32 %v609_v11, %v2021_v23  ;;  %v611_v14 = vpop.f32.mrb[53].mxu0  ;;  %v725_v15 = vpack.c.bf16 %v1551_v10, %v1547_v8 }
 0x1de   : > { %v612_v16 = vadd.f32 %v611_v14, %v2023_v24  ;;  %v613_v17 = vpop.f32.mrb[54].mxu0 }
 0x1df   : > { %1560 = vtanh.f32 %v610_v13  ;;  %v614_v18 = vadd.f32 %v613_v17, %v2021_v23  ;;  %v615_v19 = vpop.f32.mrb[55].mxu0  ;;  %989 = vmatprep.mubr.bf16.mxu1 %v725_v15 }
 0x1e0   : > { %1562 = vtanh.f32 %v612_v16  ;;  %v616_v20 = vadd.f32 %v615_v19, %v2023_v24  ;;  %990 = vmatmul.mubr.bf16.gmra.mrb[44].mxu1 %v724_v12 }
 0x1e1   : > { %v1553_v21 = vpop.eup %1552  ;;  %1564 = vtanh.f32 %v614_v18 }
 0x1e2   : > { %v1555_v22 = vpop.eup %1554  ;;  %1566 = vtanh.f32 %v616_v20 }
 0x1e3   : > { %v1557_v25 = vpop.eup %1556 }
 0x1e4   : > { %v1559_v26 = vpop.eup %1558  ;;  %v619_v0 = vpop.f32.mrb[56].mxu0  ;;  %v726_v27 = vpack.c.bf16 %v1557_v25, %v1553_v21 }
 0x1e5   : > { %v620_v28 = vadd.f32 %v619_v0, %v2021_v23  ;;  %v621_v29 = vpop.f32.mrb[57].mxu0  ;;  %v727_v30 = vpack.c.bf16 %v1559_v26, %v1555_v22 }
 0x1e6   : > { %v622_v31 = vadd.f32 %v621_v29, %v2023_v24  ;;  %v623_v32 = vpop.f32.mrb[58].mxu0 }
 0x1e7   : > { %1568 = vtanh.f32 %v620_v28  ;;  %v624_v33 = vadd.f32 %v623_v32, %v2021_v23  ;;  %v625_v34 = vpop.f32.mrb[59].mxu0  ;;  %997 = vmatprep.mubr.bf16.mxu1 %v727_v30 }
 0x1e8   : > { %1570 = vtanh.f32 %v622_v31  ;;  %v626_v35 = vadd.f32 %v625_v34, %v2023_v24  ;;  %998 = vmatmul.mubr.bf16.gmra.mrb[48].mxu1 %v726_v27 }
 0x1e9   : > { %v1561_v36 = vpop.eup %1560  ;;  %1572 = vtanh.f32 %v624_v33 }
 0x1ea   : > { %v1563_v37 = vpop.eup %1562  ;;  %1574 = vtanh.f32 %v626_v35 }
 0x1eb   : > { %v1565_v38 = vpop.eup %1564 }
 0x1ec   : > { %v1567_v39 = vpop.eup %1566  ;;  %v629_v40 = vpop.f32.mrb[60].mxu0  ;;  %v728_v41 = vpack.c.bf16 %v1565_v38, %v1561_v36 }
 0x1ed   : > { %v630_v42 = vadd.f32 %v629_v40, %v2021_v23  ;;  %v631_v43 = vpop.f32.mrb[61].mxu0  ;;  %v729_v44 = vpack.c.bf16 %v1567_v39, %v1563_v37 }
 0x1ee   : > { %v632_v45 = vadd.f32 %v631_v43, %v2023_v24  ;;  %v633_v46 = vpop.f32.mrb[62].mxu0 }
 0x1ef   : > { %1576 = vtanh.f32 %v630_v42  ;;  %v634_v47 = vadd.f32 %v633_v46, %v2021_v23  ;;  %v635_v48 = vpop.f32.mrb[63].mxu0  ;;  %1005 = vmatprep.mubr.bf16.mxu1 %v729_v44 }
 0x1f0   : > { %1578 = vtanh.f32 %v632_v45  ;;  %v636_v49 = vadd.f32 %v635_v48, %v2023_v24  ;;  %1006 = vmatmul.mubr.bf16.gmra.mrb[52].mxu1 %v728_v41 }
 0x1f1   : > { %v1569_v50 = vpop.eup %1568  ;;  %1580 = vtanh.f32 %v634_v47 }
 0x1f2   : > { %v1571_v51 = vpop.eup %1570  ;;  %1582 = vtanh.f32 %v636_v49 }
 0x1f3   : > { %v1573_v52 = vpop.eup %1572 }
 0x1f4   : > { %v1575_v53 = vpop.eup %1574  ;;  %v730_v54 = vpack.c.bf16 %v1573_v52, %v1569_v50 }
 0x1f5   : > { %v731_v55 = vpack.c.bf16 %v1575_v53, %v1571_v51 }
 0x1f7   : > { %1013 = vmatprep.mubr.bf16.mxu1 %v731_v55 }
 0x1f8   : > { %1014 = vmatmul.mubr.bf16.gmra.mrb[56].mxu1 %v730_v54 }
 0x1f9   : > { %v1577_v56 = vpop.eup %1576 }
 0x1fa   : > { %v1579_v57 = vpop.eup %1578 }
 0x1fb   : > { %v1581_v23 = vpop.eup %1580 }
 0x1fc   : > { %v1583_v58 = vpop.eup %1582  ;;  %v732_v59 = vpack.c.bf16 %v1581_v23, %v1577_v56 }
 0x1fd   : > { %v733_v60 = vpack.c.bf16 %v1583_v58, %v1579_v57 }
 0x1ff   : > { %1021 = vmatprep.mubr.bf16.mxu1 %v733_v60 }
 0x200   : > { %1022 = vmatmul.mubr.bf16.gmra.mrb[60].mxu1 %v732_v59 }
 0x25b   : > { %v1251_v24 = vpop.f32.mrb[0].mxu1 }
 0x25c   : > { %v1252_v62 = vpop.f32.mrb[1].mxu1 }
 0x25d   : > { %v1253_v63 = vadd.f32 %v1252_v62, %v1251_v24  ;;  %v1254_v1 = vpop.f32.mrb[2].mxu1 }
 0x25e   : > { %v1255_v2 = vpop.f32.mrb[3].mxu1 }
 0x25f   : > { %v904_v3 = vadd.f32 %v1253_v63, %v2092_v61  ;;  %v1256_v4 = vadd.f32 %v1255_v2, %v1254_v1 }
 0x261   : > { %1030 = vst [vmem:[%s2097_s27] sm:$0xff] %v904_v3  ;;  %v907_v5 = vadd.f32 %v1256_v4, %v2092_v61 }
 0x263   : > { %1031 = vst [vmem:[%s2097_s27 + $0x8] sm:$0xff] %v907_v5  ;;  %v1257_v6 = vpop.f32.mrb[4].mxu1 }
 0x264   : > { %v1258_v7 = vpop.f32.mrb[5].mxu1 }
 0x265   : > { %v1259_v8 = vadd.f32 %v1258_v7, %v1257_v6  ;;  %v1260_v9 = vpop.f32.mrb[6].mxu1 }
 0x266   : > { %v1261_v10 = vpop.f32.mrb[7].mxu1 }
 0x267   : > { %v912_v11 = vadd.f32 %v1259_v8, %v2092_v61  ;;  %v1262_v12 = vadd.f32 %v1261_v10, %v1260_v9 }
 0x269   : > { %1032 = vst [vmem:[%s2097_s27 + $0x10] sm:$0xff] %v912_v11  ;;  %v915_v13 = vadd.f32 %v1262_v12, %v2092_v61 }
 0x26b   : > { %1033 = vst [vmem:[%s2097_s27 + $0x18] sm:$0xff] %v915_v13  ;;  %v1263_v14 = vpop.f32.mrb[8].mxu1 }
 0x26c   : > { %v1264_v15 = vpop.f32.mrb[9].mxu1 }
 0x26d   : > { %v1265_v16 = vadd.f32 %v1264_v15, %v1263_v14  ;;  %v1266_v17 = vpop.f32.mrb[10].mxu1 }
 0x26e   : > { %v1267_v18 = vpop.f32.mrb[11].mxu1 }
 0x26f   : > { %v920_v19 = vadd.f32 %v1265_v16, %v2092_v61  ;;  %v1268_v20 = vadd.f32 %v1267_v18, %v1266_v17 }
 0x271   : > { %1034 = vst [vmem:[%s2097_s27 + $0x20] sm:$0xff] %v920_v19  ;;  %v923_v21 = vadd.f32 %v1268_v20, %v2092_v61 }
 0x273   : > { %1035 = vst [vmem:[%s2097_s27 + $0x28] sm:$0xff] %v923_v21  ;;  %v1269_v22 = vpop.f32.mrb[12].mxu1 }
 0x274   : > { %v1270_v25 = vpop.f32.mrb[13].mxu1 }
 0x275   : > { %v1271_v26 = vadd.f32 %v1270_v25, %v1269_v22  ;;  %v1272_v0 = vpop.f32.mrb[14].mxu1 }
 0x276   : > { %v1273_v27 = vpop.f32.mrb[15].mxu1 }
 0x277   : > { %v928_v28 = vadd.f32 %v1271_v26, %v2092_v61  ;;  %v1274_v29 = vadd.f32 %v1273_v27, %v1272_v0 }
 0x279   : > { %1036 = vst [vmem:[%s2097_s27 + $0x30] sm:$0xff] %v928_v28  ;;  %v931_v30 = vadd.f32 %v1274_v29, %v2092_v61 }
 0x27b   : > { %1037 = vst [vmem:[%s2097_s27 + $0x38] sm:$0xff] %v931_v30  ;;  %v1275_v31 = vpop.f32.mrb[16].mxu1 }
 0x27c   : > { %v1276_v32 = vpop.f32.mrb[17].mxu1 }
 0x27d   : > { %v1277_v33 = vadd.f32 %v1276_v32, %v1275_v31  ;;  %v1278_v34 = vpop.f32.mrb[18].mxu1 }
 0x27e   : > { %v1279_v35 = vpop.f32.mrb[19].mxu1 }
 0x27f   : > { %v936_v36 = vadd.f32 %v1277_v33, %v2092_v61  ;;  %v1280_v37 = vadd.f32 %v1279_v35, %v1278_v34 }
 0x281   : > { %1038 = vst [vmem:[%s2097_s27 + $0x40] sm:$0xff] %v936_v36  ;;  %v939_v38 = vadd.f32 %v1280_v37, %v2092_v61 }
 0x283   : > { %1039 = vst [vmem:[%s2097_s27 + $0x48] sm:$0xff] %v939_v38  ;;  %v1281_v39 = vpop.f32.mrb[20].mxu1 }
 0x284   : > { %v1282_v40 = vpop.f32.mrb[21].mxu1 }
 0x285   : > { %v1283_v41 = vadd.f32 %v1282_v40, %v1281_v39  ;;  %v1284_v42 = vpop.f32.mrb[22].mxu1 }
 0x286   : > { %v1285_v43 = vpop.f32.mrb[23].mxu1 }
 0x287   : > { %v944_v44 = vadd.f32 %v1283_v41, %v2092_v61  ;;  %v1286_v45 = vadd.f32 %v1285_v43, %v1284_v42 }
 0x289   : > { %1040 = vst [vmem:[%s2097_s27 + $0x50] sm:$0xff] %v944_v44  ;;  %v947_v46 = vadd.f32 %v1286_v45, %v2092_v61 }
 0x28b   : > { %1041 = vst [vmem:[%s2097_s27 + $0x58] sm:$0xff] %v947_v46  ;;  %v1287_v47 = vpop.f32.mrb[24].mxu1 }
 0x28c   : > { %v1288_v48 = vpop.f32.mrb[25].mxu1 }
 0x28d   : > { %v1289_v49 = vadd.f32 %v1288_v48, %v1287_v47  ;;  %v1290_v50 = vpop.f32.mrb[26].mxu1 }
 0x28e   : > { %v1291_v51 = vpop.f32.mrb[27].mxu1 }
 0x28f   : > { %v952_v52 = vadd.f32 %v1289_v49, %v2092_v61  ;;  %v1292_v53 = vadd.f32 %v1291_v51, %v1290_v50 }
 0x291   : > { %1042 = vst [vmem:[%s2097_s27 + $0x60] sm:$0xff] %v952_v52  ;;  %v955_v54 = vadd.f32 %v1292_v53, %v2092_v61 }
 0x293   : > { %1043 = vst [vmem:[%s2097_s27 + $0x68] sm:$0xff] %v955_v54  ;;  %v1293_v55 = vpop.f32.mrb[28].mxu1 }
 0x294   : > { %v1294_v56 = vpop.f32.mrb[29].mxu1 }
 0x295   : > { %v1295_v57 = vadd.f32 %v1294_v56, %v1293_v55  ;;  %v1296_v23 = vpop.f32.mrb[30].mxu1 }
 0x296   : > { %v1297_v58 = vpop.f32.mrb[31].mxu1 }
 0x297   : > { %v960_v59 = vadd.f32 %v1295_v57, %v2092_v61  ;;  %v1298_v60 = vadd.f32 %v1297_v58, %v1296_v23 }
 0x299   : > { %1044 = vst [vmem:[%s2097_s27 + $0x70] sm:$0xff] %v960_v59  ;;  %v963_v24 = vadd.f32 %v1298_v60, %v2092_v61 }
 0x29b   : > { %1045 = vst [vmem:[%s2097_s27 + $0x78] sm:$0xff] %v963_v24  ;;  %v1299_v62 = vpop.f32.mrb[32].mxu1 }
 0x29c   : > { %v1300_v63 = vpop.f32.mrb[33].mxu1 }
 0x29d   : > { %v1301_v1 = vadd.f32 %v1300_v63, %v1299_v62  ;;  %v1302_v2 = vpop.f32.mrb[34].mxu1 }
 0x29e   : > { %v1303_v3 = vpop.f32.mrb[35].mxu1 }
 0x29f   : > { %v968_v4 = vadd.f32 %v1301_v1, %v2092_v61  ;;  %v1304_v5 = vadd.f32 %v1303_v3, %v1302_v2 }
 0x2a1   : > { %1046 = vst [vmem:[%s2097_s27 + $0x80] sm:$0xff] %v968_v4  ;;  %v971_v6 = vadd.f32 %v1304_v5, %v2092_v61 }
 0x2a3   : > { %1047 = vst [vmem:[%s2097_s27 + $0x88] sm:$0xff] %v971_v6  ;;  %v1305_v7 = vpop.f32.mrb[36].mxu1 }
 0x2a4   : > { %v1306_v8 = vpop.f32.mrb[37].mxu1 }
 0x2a5   : > { %v1307_v9 = vadd.f32 %v1306_v8, %v1305_v7  ;;  %v1308_v10 = vpop.f32.mrb[38].mxu1 }
 0x2a6   : > { %v1309_v11 = vpop.f32.mrb[39].mxu1 }
 0x2a7   : > { %v976_v12 = vadd.f32 %v1307_v9, %v2092_v61  ;;  %v1310_v13 = vadd.f32 %v1309_v11, %v1308_v10 }
 0x2a9   : > { %1048 = vst [vmem:[%s2097_s27 + $0x90] sm:$0xff] %v976_v12  ;;  %v979_v14 = vadd.f32 %v1310_v13, %v2092_v61 }
 0x2ab   : > { %1049 = vst [vmem:[%s2097_s27 + $0x98] sm:$0xff] %v979_v14  ;;  %v1311_v15 = vpop.f32.mrb[40].mxu1 }
 0x2ac   : > { %v1312_v16 = vpop.f32.mrb[41].mxu1 }
 0x2ad   : > { %v1313_v17 = vadd.f32 %v1312_v16, %v1311_v15  ;;  %v1314_v18 = vpop.f32.mrb[42].mxu1 }
 0x2ae   : > { %v1315_v19 = vpop.f32.mrb[43].mxu1 }
 0x2af   : > { %v984_v20 = vadd.f32 %v1313_v17, %v2092_v61  ;;  %v1316_v21 = vadd.f32 %v1315_v19, %v1314_v18 }
 0x2b1   : > { %1050 = vst [vmem:[%s2097_s27 + $0xa0] sm:$0xff] %v984_v20  ;;  %v987_v22 = vadd.f32 %v1316_v21, %v2092_v61 }
 0x2b3   : > { %1051 = vst [vmem:[%s2097_s27 + $0xa8] sm:$0xff] %v987_v22  ;;  %v1317_v25 = vpop.f32.mrb[44].mxu1 }
 0x2b4   : > { %v1318_v26 = vpop.f32.mrb[45].mxu1 }
 0x2b5   : > { %v1319_v0 = vadd.f32 %v1318_v26, %v1317_v25  ;;  %v1320_v27 = vpop.f32.mrb[46].mxu1 }
 0x2b6   : > { %v1321_v28 = vpop.f32.mrb[47].mxu1 }
 0x2b7   : > { %v992_v29 = vadd.f32 %v1319_v0, %v2092_v61  ;;  %v1322_v30 = vadd.f32 %v1321_v28, %v1320_v27 }
 0x2b9   : > { %1052 = vst [vmem:[%s2097_s27 + $0xb0] sm:$0xff] %v992_v29  ;;  %v995_v31 = vadd.f32 %v1322_v30, %v2092_v61 }
 0x2bb   : > { %1053 = vst [vmem:[%s2097_s27 + $0xb8] sm:$0xff] %v995_v31  ;;  %v1323_v32 = vpop.f32.mrb[48].mxu1 }
 0x2bc   : > { %v1324_v33 = vpop.f32.mrb[49].mxu1 }
 0x2bd   : > { %v1325_v34 = vadd.f32 %v1324_v33, %v1323_v32  ;;  %v1326_v35 = vpop.f32.mrb[50].mxu1 }
 0x2be   : > { %v1327_v36 = vpop.f32.mrb[51].mxu1 }
 0x2bf   : > { %v1000_v37 = vadd.f32 %v1325_v34, %v2092_v61  ;;  %v1328_v38 = vadd.f32 %v1327_v36, %v1326_v35 }
 0x2c1   : > { %1054 = vst [vmem:[%s2097_s27 + $0xc0] sm:$0xff] %v1000_v37  ;;  %v1003_v39 = vadd.f32 %v1328_v38, %v2092_v61 }
 0x2c3   : > { %1055 = vst [vmem:[%s2097_s27 + $0xc8] sm:$0xff] %v1003_v39  ;;  %v1329_v40 = vpop.f32.mrb[52].mxu1 }
 0x2c4   : > { %v1330_v41 = vpop.f32.mrb[53].mxu1 }
 0x2c5   : > { %v1331_v42 = vadd.f32 %v1330_v41, %v1329_v40  ;;  %v1332_v43 = vpop.f32.mrb[54].mxu1 }
 0x2c6   : > { %v1333_v44 = vpop.f32.mrb[55].mxu1 }
 0x2c7   : > { %v1008_v45 = vadd.f32 %v1331_v42, %v2092_v61  ;;  %v1334_v46 = vadd.f32 %v1333_v44, %v1332_v43 }
 0x2c9   : > { %1056 = vst [vmem:[%s2097_s27 + $0xd0] sm:$0xff] %v1008_v45  ;;  %v1011_v47 = vadd.f32 %v1334_v46, %v2092_v61 }
 0x2cb   : > { %1057 = vst [vmem:[%s2097_s27 + $0xd8] sm:$0xff] %v1011_v47  ;;  %v1335_v48 = vpop.f32.mrb[56].mxu1 }
 0x2cc   : > { %v1336_v49 = vpop.f32.mrb[57].mxu1 }
 0x2cd   : > { %v1337_v50 = vadd.f32 %v1336_v49, %v1335_v48  ;;  %v1338_v51 = vpop.f32.mrb[58].mxu1 }
 0x2ce   : > { %v1339_v52 = vpop.f32.mrb[59].mxu1 }
 0x2cf   : > { %v1016_v53 = vadd.f32 %v1337_v50, %v2092_v61  ;;  %v1340_v54 = vadd.f32 %v1339_v52, %v1338_v51 }
 0x2d1   : > { %1058 = vst [vmem:[%s2097_s27 + $0xe0] sm:$0xff] %v1016_v53  ;;  %v1019_v55 = vadd.f32 %v1340_v54, %v2092_v61 }
 0x2d3   : > { %1059 = vst [vmem:[%s2097_s27 + $0xe8] sm:$0xff] %v1019_v55  ;;  %v1341_v56 = vpop.f32.mrb[60].mxu1 }
 0x2d4   : > { %v1342_v57 = vpop.f32.mrb[61].mxu1 }
 0x2d5   : > { %v1343_v23 = vadd.f32 %v1342_v57, %v1341_v56  ;;  %v1344_v58 = vpop.f32.mrb[62].mxu1  ;;  %1069 = sbr.rel (!%p2246_p9) target bundleno = 760 (0x2f8), region = 56 }
 0x2d6   : > { %v1345_v59 = vpop.f32.mrb[63].mxu1 }
 0x2d7   : > { %v1024_v60 = vadd.f32 %v1343_v23, %v2092_v61  ;;  %v1346_v24 = vadd.f32 %v1345_v59, %v1344_v58 }
 0x2d9   : > { %1060 = vst [vmem:[%s2097_s27 + $0xf0] sm:$0xff] %v1024_v60  ;;  %v1027_v62 = vadd.f32 %v1346_v24, %v2092_v61 }
 0x2db   : > { %1061 = vst [vmem:[%s2097_s27 + $0xf8] sm:$0xff] %v1027_v62 }
 0x2dc   : > { %s2256_s12 = smov (!%p1072_p10, %s1071_s12), 32 }
 0x2dd   : > { %s2166_s25 = sshll.u32 %s2256_s12, 7 }
 0x2de   : > { %s1076_s28 = ssub.s32 4096, %s2166_s25 }
 0x2df   : > { %1077 = vsyncadd %s1063_s8, %s1076_s28  ;;  %p1227_p1 = scmp.ne.s32.totalorder %s2166_s25, 0  ;;  %s1234_s30 = sshll.u32 %s1804_s22, 12 }
 0x2e0   : > { %s2176_s11 = scalar_lea.hbm %s2230_s5, %s1234_s30  ;;  %s1082_s14 = sshll.u32 %s2097_s27, 4  ;;  %s2179_s14 = int_to_ptr.vmem [resolvable:$true] %s1082_s14 }
 0x2e1   : > { %s1668_s15 = scalar_lea.vmem %s2179_s14, %s2166_s25  ;;  %s1750_s16 = smov [#allocation8]  }
 0x2e2   : > { %p1669_p3 = scmp.ne.s32.totalorder %s2179_s14, %s1668_s15  ;;  %s1672_s29 = sshll.u32 %s1750_s16, 4  ;;  %s1673_s29 = int_to_ptr.vmem [resolvable:$false] %s1672_s29 }
 0x2e3   : > { %s1674_s22 = scalar_lea.vmem %s1673_s29, 8192  ;;  %p1675_p11 = scmp.lt.s32.totalorder %s2179_s14, %s1673_s29 }
 0x2e4   : > { %p1670_p5 = pnand %p1669_p3, %p1227_p1  ;;  %p1676_p13 = scmp.lt.s32.totalorder %s1674_s22, %s1668_s15 }
 0x2e6   : > { %p1671_p6 = pneg %p1670_p5  ;;  %p1677_p0 = por %p1676_p13, %p1675_p11 }
 0x2e8   : > { %p1678_p12 = pnand %p1677_p0, %p1671_p6 }
 0x2ea   : > { %1681 = shalt.err (!%p1678_p12)
}
 0x2eb   : > { %s1682_s7 = scalar_lea.hbm %s2176_s11, %s2166_s25  ;;  %s1686_s27 = scalar_lea.hbm %s2230_s5, 8064 }
 0x2ec   : > { %p1683_p7 = scmp.ne.s32.totalorder %s2176_s11, %s1682_s7  ;;  %p1687_p9 = scmp.lt.u32.totalorder %s2176_s11, %s2230_s5 }
 0x2ed   : > { %p1688_p10 = scmp.lt.u32.totalorder %s1686_s27, %s1682_s7  ;;  %p1690_p5 = scmp.lt.u32.totalorder %s1682_s7, %s2176_s11 }
 0x2ee   : > { %p1684_p2 = pnand %p1683_p7, %p1227_p1 }
 0x2ef   : > { %p1689_p3 = por %p1688_p10, %p1687_p9 }
 0x2f0   : > { %p1685_p8 = pneg %p1684_p2 }
 0x2f1   : > { %p1691_p6 = por %p1690_p5, %p1689_p3 }
 0x2f3   : > { %p1692_p11 = pnand %p1691_p6, %p1685_p8 }
 0x2f5   : > { %1695 = shalt.err (!%p1692_p11)
}
 0x2f6   : > { %s1751_s28 = smov 128   ;;  %s1752_s30 = smov 8  }
 0x2f7   : > { %1088 = dma.vmem_to_hbm [thread:$0]  (%p1227_p1), %s2179_s14, %s2166_s25, %s2176_s11, %s1063_s8, %s1751_s28, %s1751_s28, %s1752_s30  }
 0x2f8 PF: > { %s1097_s26 = sand.u32 1, %s1726_s18   ;;  %p2247_p13 = scmp.ne.s32.totalorder %s2238_s6, 0 }
 0x2f9   : > { %s1098_s9 = scalar_lea.sflag [#allocation4], %s1097_s26 }
 0x2fa   : > { %p1365_p0 = pnand %p1178_p4, %p2247_p13 }
 0x2fc   : > { %1721 = dma.done.wait (!%p1365_p0), %s1098_s9, 4096  }
 0x2fd   : > { %1723 = vsyncadd (!%p1365_p0), %s1098_s9, 4294963200  ;;  %s2248_s15 = sld [smem:[#allocation12_spill]]  ;;  %p19_p12 = scmp.ge.s32.totalorder %s1808_s24, 4  }
 0x2fe   : > { %s2249_s18 = smov %s1730_s19  ;;  %s2250_s19 = smov %s1734_s20 }
 0x2ff   : > { %s2252_s21 = smov %s1808_s24  ;;  %21 = sbr.rel (!%p19_p12) target bundleno = 6 (0x6), region = 93 }
 0x303   : > { %s2251_s20 = smov %s2248_s15 }
 0x306   :  { %1103 = vsyncpa [#allocation3], 1 }
 0x307   :  { %1105 = vsyncpa [#allocation3 + $0x1], 1 }
 0x308   :  { %1106 = vsyncpa [#allocation6], 1 }
 0x309   :  { %1107 = vsyncpa [#allocation4], 1 }
 0x30a   :  { %1109 = vsyncpa [#allocation4 + $0x1], 1 }

</bundles_post_ra>
